<compile_context>
chip_gen: v6e
topology: v6e:2x2x1
jax: 0.10.0
libtpu: 0.0.40
codegen_flags: <defaults>
</compile_context>

<pallas_src>
import jax
import jax.numpy as jnp
from jax import lax
from jax.experimental import pallas as pl
from jax.experimental.pallas import tpu as pltpu

BOARD_SIZE = 9
IN_CHANNELS = 18
C_S = 48                        # stem channels
C_H = 20                        # head conv channels (per head)
P_OUT = BOARD_SIZE ** 2 + 1     # 82 policy logits
OUT_PAD = 128                   # lane-dense output: [0:82] policy, [82] value
CROP = 7                        # only stem rows/cols 0..6 ever reach the heads
X_LANES = CROP * IN_CHANNELS    # 126  input lanes   (w, c_in)
Z_LANES = CROP * C_S            # 336  stem lanes    (w, c_stem)
POOL_LANES = 4 * 4 * C_S        # 768  pooled lanes  (ho, wo, c_stem)
CONV_LANES = 4 * 2 * C_H        # 160  head-conv lanes (pos, [p|v] channel)


def _round_up(n, m):
    return ((n + m - 1) // m) * m


def _pvnet_kernel(x_ref, ws_ref, bs_ref, wc_ref, bc_ref, wl_ref, bl_ref, out_ref):
    """One grid step == TB batch elements (all f32).

    x_ref  : (7, TB, 126)  sublane row = stem row h, lanes = w*18 + c_in
    ws_ref : (126, 336)    stem 1x1 conv, block-diagonal over the 7 columns
    bs_ref : (1, 336)
    wc_ref : (768, 160)    fused p+v head conv (2x2, stride 2) on 4x4 pooled map
    bc_ref : (1, 160)
    wl_ref : (160, 128)    fused block-diagonal linear (policy->0:82, value->82)
    bl_ref : (1, 128)
    out_ref: (TB, 128)     [0:82] policy probs, [82] value, rest zeros
    """
    TB = x_ref.shape[1]

    # ---- stem: 1x1 conv over 18 channels == ONE block-diagonal matmul ----
    xf = x_ref[...].reshape(CROP * TB, X_LANES)              # rows = h*TB + b
    z = jnp.dot(xf, ws_ref[...], preferred_element_type=jnp.float32)
    z = jnp.maximum(z + bs_ref[...], 0.0)                    # (7*TB, 336)

    # ---- stem MaxPool2d(2,2,pad=1); heads only need the 4x4 pooled sub-grid.
    # Column (lane) pool first: wo=0 -> col 0, wo=k>0 -> max(col 2k-1, col 2k).
    cp = jnp.concatenate(
        [z[:, 0:C_S],
         jnp.maximum(z[:, 1 * C_S:2 * C_S], z[:, 2 * C_S:3 * C_S]),
         jnp.maximum(z[:, 3 * C_S:4 * C_S], z[:, 4 * C_S:5 * C_S]),
         jnp.maximum(z[:, 5 * C_S:6 * C_S], z[:, 6 * C_S:7 * C_S])],
        axis=1)                                              # (7*TB, 192)

    def row(h):                                              # (TB, 192)
        return cp[h * TB:(h + 1) * TB, :]

    pooled = jnp.concatenate(
        [row(0),
         jnp.maximum(row(1), row(2)),
         jnp.maximum(row(3), row(4)),
         jnp.maximum(row(5), row(6))],
        axis=1)                                              # (TB, 768) = (ho,wo,c)

    # ---- fused p+v head conv (2x2, stride 2): ONE matmul over 768 lanes ----
    conv = jnp.dot(pooled, wc_ref[...], preferred_element_type=jnp.float32)
    conv = jnp.maximum(conv + bc_ref[...], 0.0)              # (TB, 160) = (pos, o)

    # MaxPool2d(2,2,pad=1) on the 2x2 head map is the identity (exploited).
    # ---- fused block-diagonal linear: ONE matmul -> (TB, 128) logits ----
    logits = jnp.dot(conv, wl_ref[...],
                     preferred_element_type=jnp.float32) + bl_ref[...]

    # ---- masked softmax over the 82 policy lanes; value lane passes through ----
    col = lax.broadcasted_iota(jnp.int32, logits.shape, 1)
    ml = jnp.where(col < P_OUT, logits, -jnp.inf)
    m = jnp.max(ml, axis=-1, keepdims=True)
    e = jnp.exp(ml - m)                                      # exactly 0 off-policy lanes
    s = jnp.sum(e, axis=-1, keepdims=True)
    inv = pl.reciprocal(s, approx=True)                      # EUP slot
    inv = inv * (2.0 - s * inv)                              # one Newton step -> ~f32
    out_ref[...] = jnp.where(col == P_OUT, logits, e * inv)


def _pick_vmem_limit_bytes():
    """~100 MiB on v5e/v6e (128 MiB physical), ~56 MiB on v7x (64 MiB physical)."""
    try:
        cap = int(pltpu.get_tpu_info().vmem_capacity_bytes)
    except Exception:
        cap = 64 * 1024 * 1024            # conservative fallback (v7x physical)
    return max(32 * 1024 * 1024, min(cap - 8 * 1024 * 1024, 100 * 1024 * 1024))


def _pack_weights(params):
    """Fold all layer weights into 3 matmul operands + 3 lane-dense biases."""
    f32 = jnp.float32

    # Stem 1x1 conv -> (18,48) channel matmul, replicated 7x block-diagonally.
    ws = params["conv_s_w"].reshape(C_S, IN_CHANNELS).T.astype(f32)     # (18, 48)
    ws_big = jnp.zeros((X_LANES, Z_LANES), f32)
    for w in range(CROP):
        ws_big = ws_big.at[w * IN_CHANNELS:(w + 1) * IN_CHANNELS,
                           w * C_S:(w + 1) * C_S].set(ws)
    bs_big = jnp.tile(params["conv_s_b"].reshape(1, C_S).astype(f32), (1, CROP))

    # Fused p+v head conv: pooled lane (ho*192 + wo*48 + c) -> conv lane (pos*40 + o).
    wpc = jnp.transpose(params["conv_p_w"], (2, 3, 1, 0))               # (2,2,48,20)
    wvc = jnp.transpose(params["conv_v_w"], (2, 3, 1, 0))               # (2,2,48,20)
    wc = jnp.concatenate([wpc, wvc], axis=-1).astype(f32)               # (2,2,48,40)
    wc_big = jnp.zeros((POOL_LANES, CONV_LANES), f32)
    for i in range(2):
        for j in range(2):
            pos = 2 * i + j
            for dh in range(2):
                for dw in range(2):
                    r0 = (2 * i + dh) * (4 * C_S) + (2 * j + dw) * C_S
                    wc_big = wc_big.at[
                        r0:r0 + C_S,
                        pos * 2 * C_H:(pos + 1) * 2 * C_H].set(wc[dh, dw])
    bc_big = jnp.tile(jnp.concatenate([params["conv_p_b"], params["conv_v_b"]]
                                      ).reshape(1, 2 * C_H).astype(f32), (1, 4))

    # Fused block-diagonal linear. torch flatten index of a head map is c*4 + pos.
    wp = params["lin_p_w"].reshape(P_OUT, C_H, 4).astype(f32)           # [k, c, pos]
    wv = params["lin_v_w"].reshape(1, C_H, 4).astype(f32)[0]            # [c, pos]
    blk = jnp.zeros((4, 2 * C_H, OUT_PAD), f32)                         # [pos, o, k]
    blk = blk.at[:, 0:C_H, 0:P_OUT].set(jnp.transpose(wp, (2, 1, 0)))   # policy block
    blk = blk.at[:, C_H:2 * C_H, P_OUT].set(wv.T)                       # value block
    wl_big = blk.reshape(CONV_LANES, OUT_PAD)
    bl = jnp.zeros((1, OUT_PAD), f32)
    bl = bl.at[0, 0:P_OUT].set(params["lin_p_b"].astype(f32))
    bl = bl.at[0, P_OUT].set(params["lin_v_b"].astype(f32)[0])

    return ws_big, bs_big, wc_big, bc_big, wl_big, bl


@jax.jit
def pvnet_forward(x_nchw, params):
    """Layout glue (NCHW -> lane-dense spatial-major), fused weights, pallas_call."""
    B = x_nchw.shape[0]
    TB = min(512, _round_up(B, 8))            # big batch tile: amortize step overhead
    if TB > 8 and _round_up(B, TB) // TB < 2:
        TB = _round_up((B + 1) // 2, 8)       # >=2 grid steps -> both v7x TCs busy
    B_pad = _round_up(B, TB)

    # (B,18,9,9) -> (h, B, w, c), crop to the 7x7 receptive field, fold (w,c)
    # into the minor dim -> lane-dense (7, B_pad, 126) streamed input.
    xt = jnp.transpose(x_nchw.astype(jnp.float32), (2, 0, 3, 1))[:CROP, :, :CROP, :]
    xt = xt.reshape(CROP, B, X_LANES)
    if B_pad != B:
        xt = jnp.pad(xt, ((0, 0), (0, B_pad - B), (0, 0)))

    weights = _pack_weights(params)

    def const_map(ndim):
        return lambda i: (0,) * ndim

    # Note: if the input DMA is still exposed at very large B, pipeline_mode=
    # pl.Buffered(3) on this spec is the next knob to try.
    in_specs = [pl.BlockSpec((CROP, TB, X_LANES), lambda i: (0, i, 0))]
    for w in weights:                          # full-array blocks, resident across grid
        in_specs.append(pl.BlockSpec(w.shape, const_map(w.ndim)))

    out = pl.pallas_call(
        _pvnet_kernel,
        out_shape=jax.ShapeDtypeStruct((B_pad, OUT_PAD), jnp.float32),
        grid_spec=pltpu.PrefetchScalarGridSpec(
            num_scalar_prefetch=0,
            grid=(B_pad // TB,),
            in_specs=in_specs,
            out_specs=pl.BlockSpec((TB, OUT_PAD), lambda i: (i, 0))),
        compiler_params=pltpu.CompilerParams(
            dimension_semantics=("parallel",),        # megacore-shards batch tiles
            vmem_limit_bytes=_pick_vmem_limit_bytes()),
    )(xt, *weights)

    return out[:B, :P_OUT], out[:B, P_OUT:P_OUT + 1]


def pvnet_reference(x, params):
    """Pure-JAX reference with exact PyTorch (NCHW) semantics, full f32 precision."""
    hi = lax.Precision.HIGHEST
    y = jnp.einsum('bchw,oc->bohw', x,
                   params["conv_s_w"].reshape(C_S, IN_CHANNELS), precision=hi)
    y = jnp.maximum(y + params["conv_s_b"][None, :, None, None], 0.0)
    y = lax.reduce_window(y, -jnp.inf, lax.max, (1, 1, 2, 2), (1, 1, 2, 2),
                          [(0, 0), (0, 0), (1, 1), (1, 1)])

    def head(wc, bc, wl, bl):
        z = lax.conv_general_dilated(y, wc, (2, 2), 'VALID',
                                     dimension_numbers=('NCHW', 'OIHW', 'NCHW'),
                                     precision=hi)
        z = jnp.maximum(z + bc[None, :, None, None], 0.0)
        z = lax.reduce_window(z, -jnp.inf, lax.max, (1, 1, 2, 2), (1, 1, 2, 2),
                              [(0, 0), (0, 0), (1, 1), (1, 1)])
        flat = z.reshape(z.shape[0], -1)
        return jnp.dot(flat, wl.T, precision=hi) + bl

    p_logits = head(params["conv_p_w"], params["conv_p_b"],
                    params["lin_p_w"], params["lin_p_b"])
    v = head(params["conv_v_w"], params["conv_v_b"],
             params["lin_v_w"], params["lin_v_b"])
    return jax.nn.softmax(p_logits, axis=-1), v


def init_params(key):
    ks = jax.random.split(key, 10)
    nrm = lambda k, s: (0.1 * jax.random.normal(k, s)).astype(jnp.float32)
    return dict(
        conv_s_w=nrm(ks[0], (C_S, IN_CHANNELS, 1, 1)),
        conv_s_b=nrm(ks[1], (C_S,)),
        conv_v_w=nrm(ks[2], (C_H, C_S, 2, 2)),
        conv_v_b=nrm(ks[3], (C_H,)),
        lin_v_w=nrm(ks[4], (1, 80)),
        lin_v_b=nrm(ks[5], (1,)),
        conv_p_w=nrm(ks[6], (C_H, C_S, 2, 2)),
        conv_p_b=nrm(ks[7], (C_H,)),
        lin_p_w=nrm(ks[8], (P_OUT, 80)),
        lin_p_b=nrm(ks[9], (P_OUT,)),
    )


if __name__ == "__main__":
    key = jax.random.PRNGKey(0)
    k_x, k_p = jax.random.split(key)
    B = 2
    x = jax.random.normal(k_x, (B, IN_CHANNELS, BOARD_SIZE, BOARD_SIZE),
                          dtype=jnp.float32)
    params = init_params(k_p)

    p, v = pvnet_forward(x, params)
    jax.block_until_ready((p, v))

    assert p.shape == (B, P_OUT) and v.shape == (B, 1)
    p_ref, v_ref = pvnet_reference(x, params)
    assert bool(jnp.allclose(p, p_ref, atol=2e-3, rtol=2e-3)), "policy mismatch"
    assert bool(jnp.allclose(v, v_ref, atol=2e-3, rtol=2e-3)), "value mismatch"
    assert bool(jnp.allclose(jnp.sum(p, axis=-1), 1.0, atol=1e-4)), "softmax not normalized"

    print("KERNEL_OK")
</pallas_src>

<mosaic_0001>
module attributes {stable_mosaic.version = 11 : i64} {
  func.func @_pvnet_kernel(%arg0: i32, %arg1: memref<7x8x126xf32, #tpu.memory_space<vmem>>, %arg2: memref<126x336xf32, #tpu.memory_space<vmem>>, %arg3: memref<1x336xf32, #tpu.memory_space<vmem>>, %arg4: memref<768x160xf32, #tpu.memory_space<vmem>>, %arg5: memref<1x160xf32, #tpu.memory_space<vmem>>, %arg6: memref<160x128xf32, #tpu.memory_space<vmem>>, %arg7: memref<1x128xf32, #tpu.memory_space<vmem>>, %arg8: memref<8x128xf32, #tpu.memory_space<vmem>>) attributes {dimension_semantics = [#tpu.dimension_semantics<parallel>], iteration_bounds = array<i64: 1>, scalar_prefetch = 0 : i64, scratch_operands = 0 : i64, tpu.core_type = #tpu.core_type<tc>, window_params = [{transform_indices = @transform_0, window_bounds = array<i64: 7, 8, 126>}, {pipeline_mode = #tpu.pipeline_mode<synchronous>, transform_indices = @transform_1, window_bounds = array<i64: 126, 336>}, {pipeline_mode = #tpu.pipeline_mode<synchronous>, transform_indices = @transform_2, window_bounds = array<i64: 1, 336>}, {pipeline_mode = #tpu.pipeline_mode<synchronous>, transform_indices = @transform_3, window_bounds = array<i64: 768, 160>}, {pipeline_mode = #tpu.pipeline_mode<synchronous>, transform_indices = @transform_4, window_bounds = array<i64: 1, 160>}, {pipeline_mode = #tpu.pipeline_mode<synchronous>, transform_indices = @transform_5, window_bounds = array<i64: 160, 128>}, {pipeline_mode = #tpu.pipeline_mode<synchronous>, transform_indices = @transform_6, window_bounds = array<i64: 1, 128>}, {transform_indices = @transform_7, window_bounds = array<i64: 8, 128>}]} {
    %c0 = arith.constant 0 : index
    %c0_0 = arith.constant 0 : index
    %c0_1 = arith.constant 0 : index
    %0 = vector.load %arg1[%c0, %c0_0, %c0_1] : memref<7x8x126xf32, #tpu.memory_space<vmem>>, vector<7x8x126xf32>
    %1 = vector.shape_cast %0 : vector<7x8x126xf32> to vector<56x126xf32>
    %c0_2 = arith.constant 0 : index
    %c0_3 = arith.constant 0 : index
    %2 = vector.load %arg2[%c0_2, %c0_3] : memref<126x336xf32, #tpu.memory_space<vmem>>, vector<126x336xf32>
    %cst = arith.constant dense<0.000000e+00> : vector<56x336xf32>
    %3 = tpu.matmul %1, %2, %cst {dimension_numbers = #tpu.dot_dimension_numbers<[1], [0], [0], [1], [0, 0, 1, 1], [], []>} : vector<56x126xf32>, vector<126x336xf32>, vector<56x336xf32> -> vector<56x336xf32>
    %c0_4 = arith.constant 0 : index
    %c0_5 = arith.constant 0 : index
    %4 = vector.load %arg3[%c0_4, %c0_5] : memref<1x336xf32, #tpu.memory_space<vmem>>, vector<1x336xf32>
    %5 = vector.broadcast %4 : vector<1x336xf32> to vector<56x336xf32>
    %6 = arith.addf %3, %5 : vector<56x336xf32>
    %cst_6 = arith.constant 0.000000e+00 : f32
    %7 = vector.broadcast %cst_6 : f32 to vector<56x336xf32>
    %8 = arith.maximumf %6, %7 : vector<56x336xf32>
    %9 = vector.extract_strided_slice %8 {offsets = [0, 0], sizes = [56, 48], strides = [1, 1]} : vector<56x336xf32> to vector<56x48xf32>
    %10 = vector.extract_strided_slice %8 {offsets = [0, 48], sizes = [56, 48], strides = [1, 1]} : vector<56x336xf32> to vector<56x48xf32>
    %11 = vector.extract_strided_slice %8 {offsets = [0, 96], sizes = [56, 48], strides = [1, 1]} : vector<56x336xf32> to vector<56x48xf32>
    %12 = arith.maximumf %10, %11 : vector<56x48xf32>
    %13 = vector.extract_strided_slice %8 {offsets = [0, 144], sizes = [56, 48], strides = [1, 1]} : vector<56x336xf32> to vector<56x48xf32>
    %14 = vector.extract_strided_slice %8 {offsets = [0, 192], sizes = [56, 48], strides = [1, 1]} : vector<56x336xf32> to vector<56x48xf32>
    %15 = arith.maximumf %13, %14 : vector<56x48xf32>
    %16 = vector.extract_strided_slice %8 {offsets = [0, 240], sizes = [56, 48], strides = [1, 1]} : vector<56x336xf32> to vector<56x48xf32>
    %17 = vector.extract_strided_slice %8 {offsets = [0, 288], sizes = [56, 48], strides = [1, 1]} : vector<56x336xf32> to vector<56x48xf32>
    %18 = arith.maximumf %16, %17 : vector<56x48xf32>
    %19 = tpu.concatenate %9, %12, %15, %18 in 1 : vector<56x48xf32>, vector<56x48xf32>, vector<56x48xf32>, vector<56x48xf32> -> vector<56x192xf32>
    %20 = vector.extract_strided_slice %19 {offsets = [0, 0], sizes = [8, 192], strides = [1, 1]} : vector<56x192xf32> to vector<8x192xf32>
    %21 = vector.extract_strided_slice %19 {offsets = [8, 0], sizes = [8, 192], strides = [1, 1]} : vector<56x192xf32> to vector<8x192xf32>
    %22 = vector.extract_strided_slice %19 {offsets = [16, 0], sizes = [8, 192], strides = [1, 1]} : vector<56x192xf32> to vector<8x192xf32>
    %23 = arith.maximumf %21, %22 : vector<8x192xf32>
    %24 = vector.extract_strided_slice %19 {offsets = [24, 0], sizes = [8, 192], strides = [1, 1]} : vector<56x192xf32> to vector<8x192xf32>
    %25 = vector.extract_strided_slice %19 {offsets = [32, 0], sizes = [8, 192], strides = [1, 1]} : vector<56x192xf32> to vector<8x192xf32>
    %26 = arith.maximumf %24, %25 : vector<8x192xf32>
    %27 = vector.extract_strided_slice %19 {offsets = [40, 0], sizes = [8, 192], strides = [1, 1]} : vector<56x192xf32> to vector<8x192xf32>
    %28 = vector.extract_strided_slice %19 {offsets = [48, 0], sizes = [8, 192], strides = [1, 1]} : vector<56x192xf32> to vector<8x192xf32>
    %29 = arith.maximumf %27, %28 : vector<8x192xf32>
    %30 = tpu.concatenate %20, %23, %26, %29 in 1 : vector<8x192xf32>, vector<8x192xf32>, vector<8x192xf32>, vector<8x192xf32> -> vector<8x768xf32>
    %c0_7 = arith.constant 0 : index
    %c0_8 = arith.constant 0 : index
    %31 = vector.load %arg4[%c0_7, %c0_8] : memref<768x160xf32, #tpu.memory_space<vmem>>, vector<768x160xf32>
    %cst_9 = arith.constant dense<0.000000e+00> : vector<8x160xf32>
    %32 = tpu.matmul %30, %31, %cst_9 {dimension_numbers = #tpu.dot_dimension_numbers<[1], [0], [0], [1], [0, 0, 1, 1], [], []>} : vector<8x768xf32>, vector<768x160xf32>, vector<8x160xf32> -> vector<8x160xf32>
    %c0_10 = arith.constant 0 : index
    %c0_11 = arith.constant 0 : index
    %33 = vector.load %arg5[%c0_10, %c0_11] : memref<1x160xf32, #tpu.memory_space<vmem>>, vector<1x160xf32>
    %34 = vector.broadcast %33 : vector<1x160xf32> to vector<8x160xf32>
    %35 = arith.addf %32, %34 : vector<8x160xf32>
    %cst_12 = arith.constant 0.000000e+00 : f32
    %36 = vector.broadcast %cst_12 : f32 to vector<8x160xf32>
    %37 = arith.maximumf %35, %36 : vector<8x160xf32>
    %c0_13 = arith.constant 0 : index
    %c0_14 = arith.constant 0 : index
    %38 = vector.load %arg6[%c0_13, %c0_14] : memref<160x128xf32, #tpu.memory_space<vmem>>, vector<160x128xf32>
    %cst_15 = arith.constant dense<0.000000e+00> : vector<8x128xf32>
    %39 = tpu.matmul %37, %38, %cst_15 {dimension_numbers = #tpu.dot_dimension_numbers<[1], [0], [0], [1], [0, 0, 1, 1], [], []>} : vector<8x160xf32>, vector<160x128xf32>, vector<8x128xf32> -> vector<8x128xf32>
    %c0_16 = arith.constant 0 : index
    %c0_17 = arith.constant 0 : index
    %40 = vector.load %arg7[%c0_16, %c0_17] : memref<1x128xf32, #tpu.memory_space<vmem>>, vector<1x128xf32>
    %41 = vector.broadcast %40 : vector<1x128xf32> to vector<8x128xf32>
    %42 = arith.addf %39, %41 : vector<8x128xf32>
    %43 = tpu.iota {dimensions = array<i32: 1>} : vector<8x128xi32>
    %c82_i32 = arith.constant 82 : i32
    %44 = vector.broadcast %c82_i32 : i32 to vector<8x128xi32>
    %45 = arith.cmpi slt, %43, %44 : vector<8x128xi32>
    %cst_18 = arith.constant 0xFF800000 : f32
    %46 = vector.broadcast %cst_18 : f32 to vector<8x128xf32>
    %47 = arith.select %45, %42, %46 : vector<8x128xi1>, vector<8x128xf32>
    %cst_19 = arith.constant dense<0xFF800000> : vector<8xf32>
    %48 = vector.multi_reduction <maximumf>, %47, %cst_19 [1] : vector<8x128xf32> to vector<8xf32>
    %49 = vector.shape_cast %48 : vector<8xf32> to vector<8x1xf32>
    %50 = vector.broadcast %49 : vector<8x1xf32> to vector<8x128xf32>
    %51 = arith.subf %47, %50 : vector<8x128xf32>
    %52 = math.exp %51 : vector<8x128xf32>
    %cst_20 = arith.constant dense<0.000000e+00> : vector<8xf32>
    %53 = vector.multi_reduction <add>, %52, %cst_20 [1] : vector<8x128xf32> to vector<8xf32>
    %54 = vector.shape_cast %53 : vector<8xf32> to vector<8x1xf32>
    %55 = tpu.reciprocal %54 {approx = true} : vector<8x1xf32> -> vector<8x1xf32>
    %56 = arith.mulf %54, %55 : vector<8x1xf32>
    %cst_21 = arith.constant 2.000000e+00 : f32
    %57 = vector.broadcast %cst_21 : f32 to vector<8x1xf32>
    %58 = arith.subf %57, %56 : vector<8x1xf32>
    %59 = arith.mulf %55, %58 : vector<8x1xf32>
    %c82_i32_22 = arith.constant 82 : i32
    %60 = vector.broadcast %c82_i32_22 : i32 to vector<8x128xi32>
    %61 = arith.cmpi eq, %43, %60 : vector<8x128xi32>
    %62 = vector.broadcast %59 : vector<8x1xf32> to vector<8x128xf32>
    %63 = arith.mulf %52, %62 : vector<8x128xf32>
    %64 = arith.select %61, %42, %63 : vector<8x128xi1>, vector<8x128xf32>
    %c0_23 = arith.constant 0 : index
    %c0_24 = arith.constant 0 : index
    %65 = vector.load %arg8[%c0_23, %c0_24] : memref<8x128xf32, #tpu.memory_space<vmem>>, vector<8x128xf32>
    tpu.vector_store %arg8[%c0_23, %c0_24], %64 {strides = array<i32>} : memref<8x128xf32, #tpu.memory_space<vmem>>, vector<8x128xf32>,
    return
  }
  func.func @transform_0(%arg0: i32) -> (i32, i32, i32) {
    %c0_i32 = arith.constant 0 : i32
    %c0_i32_0 = arith.constant 0 : i32
    %c0_i32_1 = arith.constant 0 : i32
    return %c0_i32, %arg0, %c0_i32_0 : i32, i32, i32
  }
  func.func @transform_1(%arg0: i32) -> (i32, i32) {
    %c0_i32 = arith.constant 0 : i32
    %c0_i32_0 = arith.constant 0 : i32
    %c0_i32_1 = arith.constant 0 : i32
    return %c0_i32, %c0_i32_0 : i32, i32
  }
  func.func @transform_2(%arg0: i32) -> (i32, i32) {
    %c0_i32 = arith.constant 0 : i32
    %c0_i32_0 = arith.constant 0 : i32
    %c0_i32_1 = arith.constant 0 : i32
    return %c0_i32, %c0_i32_0 : i32, i32
  }
  func.func @transform_3(%arg0: i32) -> (i32, i32) {
    %c0_i32 = arith.constant 0 : i32
    %c0_i32_0 = arith.constant 0 : i32
    %c0_i32_1 = arith.constant 0 : i32
    return %c0_i32, %c0_i32_0 : i32, i32
  }
  func.func @transform_4(%arg0: i32) -> (i32, i32) {
    %c0_i32 = arith.constant 0 : i32
    %c0_i32_0 = arith.constant 0 : i32
    %c0_i32_1 = arith.constant 0 : i32
    return %c0_i32, %c0_i32_0 : i32, i32
  }
  func.func @transform_5(%arg0: i32) -> (i32, i32) {
    %c0_i32 = arith.constant 0 : i32
    %c0_i32_0 = arith.constant 0 : i32
    %c0_i32_1 = arith.constant 0 : i32
    return %c0_i32, %c0_i32_0 : i32, i32
  }
  func.func @transform_6(%arg0: i32) -> (i32, i32) {
    %c0_i32 = arith.constant 0 : i32
    %c0_i32_0 = arith.constant 0 : i32
    %c0_i32_1 = arith.constant 0 : i32
    return %c0_i32, %c0_i32_0 : i32, i32
  }
  func.func @transform_7(%arg0: i32) -> (i32, i32) {
    %c0_i32 = arith.constant 0 : i32
    %c0_i32_0 = arith.constant 0 : i32
    return %arg0, %c0_i32 : i32, i32
  }
}

</mosaic_0001>

<bundles_post_ra>
// kernel: pvnet_forward.1
= control target key start
LH: loop header
LB: loop body
LE: loop exit
PB: predicated region body
PF: predicated region fallthrough
CT: control target
= control target key end

     0   :  { %vm120_vm0 = vcmask 1045504   ;;  %v1370_v3 = vmov 0.0   ;;  %vm1371_vm1 = vmmov 0   ;;  %vm98_vm2 = vcmask 1031168   ;;  %s1374_s28 = smov 64   ;;  %s2619_s1 = inlined_call_operand.vmem [shape: f32[126,336], index: 1, kind: input, shape index: {}]   ;;  %s2620_s0 = inlined_call_operand.vmem [shape: f32[7,8,126], index: 0, kind: input, shape index: {}]   ;;  %s2621_s2 = inlined_call_operand.vmem [shape: f32[1,336], index: 2, kind: input, shape index: {}]   ;;  %s2622_s3 = inlined_call_operand.vmem [shape: f32[768,160], index: 3, kind: input, shape index: {}]   ;;  %s2623_s5 = inlined_call_operand.vmem [shape: f32[160,128], index: 5, kind: input, shape index: {}]   ;;  %s2624_s4 = inlined_call_operand.vmem [shape: f32[1,160], index: 4, kind: input, shape index: {}]   ;;  %s2625_s6 = inlined_call_operand.vmem [shape: f32[1,128], index: 6, kind: input, shape index: {}]   ;;  %s2626_s7 = inlined_call_operand.vmem [shape: f32[8,128], index: 7, kind: output, shape index: {}]  }
   0x1   :  { %v79_v0 = vld [vmem:[%s2619_s1 + $0x170] sm:$0x3f]  ;;  %v78_v1 = vld [vmem:[%s2619_s1 + $0x168] sm:$0x3f]  ;;  %v76_v2 = vld [vmem:[%s2619_s1 + $0x158] sm:$0xff]  ;;  %1198 = vmatprep.subr.mxu1 %v1370_v3  ;;  %194 = vmatprep.mubr.f32.mxu0 %v1370_v3  ;;  %v83_v56 = vlaneseq  ;;  %vm400_vm3 = vcmask 654336  }
   0x2   :  { %1156 = vmatprep.subr.msk.mxu0 %vm120_vm0, %v79_v0  ;;  %v75_v4 = vld [vmem:[%s2619_s1 + $0x150] sm:$0xff]  ;;  %v80_v5 = vld [vmem:[%s2619_s1 + $0x178] sm:$0x3f]  ;;  %1230 = vmatprep.mubr.msk.f32.mxu1 %vm1371_vm1, %v1370_v3  ;;  %v73_v6 = vld [vmem:[%s2619_s1 + $0x140] sm:$0xff]  ;;  %vm563_vm4 = vcmask 392192   ;;  %vm571_vm5 = vcmask 785408  }
   0x3   :  { %1157 = vmatpush1.msk.msra.mxu0 %vm120_vm0, %v78_v1  ;;  %1199 = vmatpush3.msk.msra.mxu1 %vm120_vm0, %v80_v5  ;;  %v77_v7 = vld [vmem:[%s2619_s1 + $0x160] sm:$0xff]  ;;  %v72_v8 = vld [vmem:[%s2619_s1 + $0x138] sm:$0xff]  ;;  %v74_v9 = vld [vmem:[%s2619_s1 + $0x148] sm:$0xff]  ;;  %v1632_v57 = vshrl.u32 %v83_v56, 7  ;;  %vm548_vm6 = vcmask 261120   ;;  %vm579_vm7 = vcmask 130048  }
   0x4   :  { %132 = vmatprep.subr.mxu0 %v76_v2  ;;  %1200 = vmatprep.subr.mxu1 %v1370_v3  ;;  %v70_v10 = vld [vmem:[%s2619_s1 + $0x128] sm:$0xff]  ;;  %v69_v11 = vld [vmem:[%s2619_s1 + $0x120] sm:$0xff]  ;;  %v71_v12 = vld [vmem:[%s2619_s1 + $0x130] sm:$0xff]  ;;  %vm599_vm8 = vcmask 523264  }
   0x5   :  { %133 = vmatpush1.msra.mxu0 %v75_v4  ;;  %1201 = vmatpush3.msra.mxu1 %v77_v7  ;;  %v67_v13 = vld [vmem:[%s2619_s1 + $0x110] sm:$0xff]  ;;  %v66_v14 = vld [vmem:[%s2619_s1 + $0x108] sm:$0xff]  ;;  %v68_v15 = vld [vmem:[%s2619_s1 + $0x118] sm:$0xff]  ;;  %v85_v58 = vsub.s32 0, %v1632_v57  ;;  %v93_v59 = vsub.s32 2, %v1632_v57  ;;  %v89_v61 = vsub.s32 1, %v1632_v57 }
   0x6   :  { %134 = vmatprep.subr.mxu0 %v73_v6  ;;  %1202 = vmatprep.subr.mxu1 %v1370_v3  ;;  %v64_v16 = vld [vmem:[%s2619_s1 + $0xf8] sm:$0xff]  ;;  %v63_v17 = vld [vmem:[%s2619_s1 + $0xf0] sm:$0xff]  ;;  %v65_v18 = vld [vmem:[%s2619_s1 + $0x100] sm:$0xff] }
   0x7   :  { %135 = vmatpush1.msra.mxu0 %v72_v8  ;;  %1203 = vmatpush3.msra.mxu1 %v74_v9  ;;  %v61_v19 = vld [vmem:[%s2619_s1 + $0xe0] sm:$0xff]  ;;  %v60_v20 = vld [vmem:[%s2619_s1 + $0xd8] sm:$0xff]  ;;  %v62_v21 = vld [vmem:[%s2619_s1 + $0xe8] sm:$0xff] }
   0x8   :  { %136 = vmatprep.subr.mxu0 %v70_v10  ;;  %1204 = vmatprep.subr.mxu1 %v1370_v3  ;;  %v58_v22 = vld [vmem:[%s2619_s1 + $0xc8] sm:$0xff]  ;;  %v57_v23 = vld [vmem:[%s2619_s1 + $0xc0] sm:$0xff]  ;;  %v59_v24 = vld [vmem:[%s2619_s1 + $0xd0] sm:$0xff] }
   0x9   :  { %137 = vmatpush1.msra.mxu0 %v69_v11  ;;  %1205 = vmatpush3.msra.mxu1 %v71_v12  ;;  %v55_v25 = vld [vmem:[%s2619_s1 + $0xb0] sm:$0xff]  ;;  %v54_v26 = vld [vmem:[%s2619_s1 + $0xa8] sm:$0xff]  ;;  %v56_v27 = vld [vmem:[%s2619_s1 + $0xb8] sm:$0xff] }
   0xa   :  { %138 = vmatprep.subr.mxu0 %v67_v13  ;;  %1206 = vmatprep.subr.mxu1 %v1370_v3  ;;  %v52_v28 = vld [vmem:[%s2619_s1 + $0x98] sm:$0xff]  ;;  %v51_v29 = vld [vmem:[%s2619_s1 + $0x90] sm:$0xff]  ;;  %v53_v30 = vld [vmem:[%s2619_s1 + $0xa0] sm:$0xff] }
   0xb   :  { %139 = vmatpush1.msra.mxu0 %v66_v14  ;;  %1207 = vmatpush3.msra.mxu1 %v68_v15  ;;  %v49_v31 = vld [vmem:[%s2619_s1 + $0x80] sm:$0xff]  ;;  %v48_v32 = vld [vmem:[%s2619_s1 + $0x78] sm:$0xff]  ;;  %v50_v33 = vld [vmem:[%s2619_s1 + $0x88] sm:$0xff] }
   0xc   :  { %140 = vmatprep.subr.mxu0 %v64_v16  ;;  %1208 = vmatprep.subr.mxu1 %v1370_v3  ;;  %v46_v34 = vld [vmem:[%s2619_s1 + $0x68] sm:$0xff]  ;;  %v45_v35 = vld [vmem:[%s2619_s1 + $0x60] sm:$0xff]  ;;  %v47_v36 = vld [vmem:[%s2619_s1 + $0x70] sm:$0xff] }
   0xd   :  { %141 = vmatpush1.msra.mxu0 %v63_v17  ;;  %1209 = vmatpush3.msra.mxu1 %v65_v18  ;;  %v43_v37 = vld [vmem:[%s2619_s1 + $0x50] sm:$0xff]  ;;  %v42_v38 = vld [vmem:[%s2619_s1 + $0x48] sm:$0xff]  ;;  %v44_v39 = vld [vmem:[%s2619_s1 + $0x58] sm:$0xff] }
   0xe   :  { %142 = vmatprep.subr.mxu0 %v61_v19  ;;  %1210 = vmatprep.subr.mxu1 %v1370_v3  ;;  %v40_v40 = vld [vmem:[%s2619_s1 + $0x38] sm:$0xff]  ;;  %v39_v41 = vld [vmem:[%s2619_s1 + $0x30] sm:$0xff]  ;;  %v41_v42 = vld [vmem:[%s2619_s1 + $0x40] sm:$0xff] }
   0xf   :  { %143 = vmatpush1.msra.mxu0 %v60_v20  ;;  %1211 = vmatpush3.msra.mxu1 %v62_v21  ;;  %v37_v43 = vld [vmem:[%s2619_s1 + $0x20] sm:$0xff]  ;;  %v36_v44 = vld [vmem:[%s2619_s1 + $0x18] sm:$0xff]  ;;  %v38_v45 = vld [vmem:[%s2619_s1 + $0x28] sm:$0xff] }
  0x10   :  { %144 = vmatprep.subr.mxu0 %v58_v22  ;;  %1212 = vmatprep.subr.mxu1 %v1370_v3  ;;  %v34_v46 = vld [vmem:[%s2619_s1 + $0x8] sm:$0xff]  ;;  %v33_v47 = vld [vmem:[%s2619_s1] sm:$0xff]  ;;  %v35_v48 = vld [vmem:[%s2619_s1 + $0x10] sm:$0xff] }
  0x11   :  { %145 = vmatpush1.msra.mxu0 %v57_v23  ;;  %1213 = vmatpush3.msra.mxu1 %v59_v24  ;;  %v26_v49 = vld [vmem:[%s2620_s0] sm:$0xff]  ;;  %v27_v50 = vld [vmem:[%s2620_s0 + $0x8] sm:$0xff]  ;;  %v28_v51 = vld [vmem:[%s2620_s0 + $0x10] sm:$0xff] }
  0x12   :  { %146 = vmatprep.subr.mxu0 %v55_v25  ;;  %1214 = vmatprep.subr.mxu1 %v1370_v3  ;;  %v29_v52 = vld [vmem:[%s2620_s0 + $0x18] sm:$0xff]  ;;  %v30_v53 = vld [vmem:[%s2620_s0 + $0x20] sm:$0xff]  ;;  %v31_v54 = vld [vmem:[%s2620_s0 + $0x28] sm:$0xff] }
  0x13   :  { %147 = vmatpush1.msra.mxu0 %v54_v26  ;;  %1215 = vmatpush3.msra.mxu1 %v56_v27  ;;  %v32_v55 = vld [vmem:[%s2620_s0 + $0x30] sm:$0xff]  ;;  %v81_v60 = vld [vmem:[%s2621_s2] sm:$0x7]  ;;  %s1372_s0 = smov 80   ;;  %s1373_s2 = smov 32  }
  0x14   :  { %148 = vmatprep.subr.mxu0 %v52_v28  ;;  %1216 = vmatprep.subr.mxu1 %v1370_v3  ;;  %v1642_v62 = vrot.slane %v81_v60, %v85_v58  ;;  %v1644_v63 = vrot.slane %v81_v60, %v93_v59  ;;  %v1648_v0 = vrot.slane %v81_v60, %v89_v61  ;;  %v1173_v57 = vld [vmem:[%s2625_s6] ss:$0 sm:$0xff] }
  0x15   :  { %149 = vmatpush1.msra.mxu0 %v51_v29  ;;  %1217 = vmatpush3.msra.mxu1 %v53_v30 }
  0x16   :  { %150 = vmatprep.subr.mxu0 %v49_v31  ;;  %1218 = vmatprep.subr.mxu1 %v1370_v3 }
  0x17   :  { %151 = vmatpush1.msra.mxu0 %v48_v32  ;;  %1219 = vmatpush3.msra.mxu1 %v50_v33 }
  0x18   :  { %152 = vmatprep.subr.mxu0 %v46_v34  ;;  %1220 = vmatprep.subr.mxu1 %v1370_v3 }
  0x19   :  { %153 = vmatpush1.msra.mxu0 %v45_v35  ;;  %1221 = vmatpush3.msra.mxu1 %v47_v36 }
  0x1a   :  { %154 = vmatprep.subr.mxu0 %v43_v37  ;;  %1222 = vmatprep.subr.mxu1 %v1370_v3 }
  0x1b   :  { %155 = vmatpush1.msra.mxu0 %v42_v38  ;;  %1223 = vmatpush3.msra.mxu1 %v44_v39 }
  0x1c   :  { %156 = vmatprep.subr.mxu0 %v40_v40  ;;  %1224 = vmatprep.subr.mxu1 %v1370_v3 }
  0x1d   :  { %157 = vmatpush1.msra.mxu0 %v39_v41  ;;  %1225 = vmatpush3.msra.mxu1 %v41_v42 }
  0x1e   :  { %158 = vmatprep.subr.mxu0 %v37_v43  ;;  %1226 = vmatprep.subr.mxu1 %v1370_v3 }
  0x1f   :  { %159 = vmatpush1.msra.mxu0 %v36_v44  ;;  %1227 = vmatpush3.msra.mxu1 %v38_v45 }
  0x20   :  { %160 = vmatprep.subr.mxu0 %v34_v46  ;;  %1228 = vmatprep.subr.mxu1 %v1370_v3 }
  0x21   :  { %161 = vmatpush1.msra.mxu0 %v33_v47  ;;  %1229 = vmatpush3.msra.mxu1 %v35_v48 }
  0x22   :  { %1158 = vmatmul.mubr.msk.f32.vlgmr.msra.gmra.mxu0 %vm98_vm2, %v26_v49  ;;  %1231 = vmatmul.mubr.msk.f32.vlgmr.msra.gmra.mxu1 %vm98_vm2, %v26_v49 }
  0x23   :  { %200 = vmatprep.mubr.f32.mxu0 %v1370_v3  ;;  %1233 = vmatprep.mubr.msk.f32.mxu1 %vm1371_vm1, %v1370_v3 }
  0x26   :  { %1159 = vmatmul.mubr.msk.f32.gmra.mxu0 %vm98_vm2, %v27_v50  ;;  %1234 = vmatmul.mubr.msk.f32.gmra.mxu1 %vm98_vm2, %v27_v50 }
  0x27   :  { %206 = vmatprep.mubr.f32.mxu0 %v1370_v3  ;;  %1236 = vmatprep.mubr.msk.f32.mxu1 %vm1371_vm1, %v1370_v3 }
  0x2a   :  { %1160 = vmatmul.mubr.msk.f32.gmra.mxu0 %vm98_vm2, %v28_v51  ;;  %1237 = vmatmul.mubr.msk.f32.gmra.mxu1 %vm98_vm2, %v28_v51 }
  0x2b   :  { %212 = vmatprep.mubr.f32.mxu0 %v1370_v3  ;;  %1239 = vmatprep.mubr.msk.f32.mxu1 %vm1371_vm1, %v1370_v3 }
  0x2e   :  { %1161 = vmatmul.mubr.msk.f32.gmra.mxu0 %vm98_vm2, %v29_v52  ;;  %1240 = vmatmul.mubr.msk.f32.gmra.mxu1 %vm98_vm2, %v29_v52 }
  0x2f   :  { %218 = vmatprep.mubr.f32.mxu0 %v1370_v3  ;;  %1242 = vmatprep.mubr.msk.f32.mxu1 %vm1371_vm1, %v1370_v3 }
  0x32   :  { %1162 = vmatmul.mubr.msk.f32.gmra.mxu0 %vm98_vm2, %v30_v53  ;;  %1243 = vmatmul.mubr.msk.f32.gmra.mxu1 %vm98_vm2, %v30_v53 }
  0x33   :  { %224 = vmatprep.mubr.f32.mxu0 %v1370_v3  ;;  %1245 = vmatprep.mubr.msk.f32.mxu1 %vm1371_vm1, %v1370_v3 }
  0x36   :  { %1163 = vmatmul.mubr.msk.f32.gmra.mxu0 %vm98_vm2, %v31_v54  ;;  %1246 = vmatmul.mubr.msk.f32.gmra.mxu1 %vm98_vm2, %v31_v54 }
  0x37   :  { %230 = vmatprep.mubr.f32.mxu0 %v1370_v3  ;;  %1248 = vmatprep.mubr.msk.f32.mxu1 %vm1371_vm1, %v1370_v3 }
  0x3a   :  { %1164 = vmatmul.mubr.msk.f32.gmra.mxu0 %vm98_vm2, %v32_v55  ;;  %1249 = vmatmul.mubr.msk.f32.gmra.mxu1 %vm98_vm2, %v32_v55 }
  0xe2   :  { %v196_v1 = vpop.f32.mrf.mxu0  ;;  %v303_v2 = vpop.f32.mrf.mxu1 }
  0xe3   :  { %v1651_v4 = vadd.f32 %v196_v1, %v1642_v62  ;;  %v1654_v5 = vadd.f32 %v303_v2, %v1644_v63 }
  0xe4   :  { %v198_v6 = vpop.f32.mrf.mxu0  ;;  %v1232_v7 = vpop.f32.mrf.mxu1 }
  0xe5   :  { %v199_v8 = vadd.f32 %v198_v6, %v1648_v0  ;;  %v339_v9 = vmax.f32 %v1654_v5, 0.0  ;;  %v645_v5 = vld [vmem:[%s2622_s3 + $0xf8] sm:$0xff] }
  0xe6   :  { %v202_v10 = vpop.f32.mrf.mxu0  ;;  %v308_v11 = vpop.f32.mrf.mxu1  ;;  %818 = vmatprep.subr.mxu0 %v645_v5  ;;  %v677_v5 = vld [vmem:[%s2622_s3 + $0x1f8] sm:$0xff] }
  0xe7   :  { %v1658_v12 = vmax.f32 %v199_v8, 0.0  ;;  %v203_v23 = vadd.f32 %v202_v10, %v1642_v62  ;;  %v1669_v25 = vadd.f32 %v308_v11, %v1644_v63 }
  0xe8   :  { %v204_v13 = vpop.f32.mrf.mxu0  ;;  %v1235_v14 = vpop.f32.mrf.mxu1 }
  0xe9   :  { %v1266_v15 = vpack.i.bf16 %v1658_v12, %v339_v9  ;;  %v205_v18 = vadd.f32 %v204_v13, %v1648_v0  ;;  %v1688_v36 = vmax.f32 %v203_v23, 0.0  ;;  %v342_v39 = vmax.f32 %v1669_v25, 0.0 }
  0xea   :  { %v208_v16 = vpop.f32.mrf.mxu0  ;;  %v313_v17 = vpop.f32.mrf.mxu1 }
  0xeb   :  { %1267 = vrot.lane.b32.xlu1 %v1266_v15, %s1372_s0  ;;  %v209_v21 = vadd.f32 %v208_v16, %v1642_v62  ;;  %v1671_v27 = vmax.f32 %v205_v18, 0.0  ;;  %v1679_v30 = vadd.f32 %v313_v17, %v1644_v63 }
  0xec   :  { %v210_v19 = vpop.f32.mrf.mxu0  ;;  %v1238_v20 = vpop.f32.mrf.mxu1 }
  0xed   :  { %v211_v22 = vadd.f32 %v210_v19, %v1648_v0  ;;  %v1684_v34 = vmax.f32 %v209_v21, 0.0  ;;  %v345_v41 = vmax.f32 %v1679_v30, 0.0  ;;  %v637_v30 = vld [vmem:[%s2622_s3 + $0xb8] sm:$0xff] }
  0xee   :  { %v214_v24 = vpop.f32.mrf.mxu0  ;;  %v318_v26 = vpop.f32.mrf.mxu1 }
  0xef   :  { %v1673_v28 = vmax.f32 %v211_v22, 0.0  ;;  %v1676_v29 = vadd.f32 %v214_v24, %v1642_v62  ;;  %v1682_v32 = vadd.f32 %v318_v26, %v1644_v63  ;;  %v1261_v46 = vpack.i.bf16 %v1684_v34, %v1688_v36 }
  0xf0   :  { %v216_v31 = vpop.f32.mrf.mxu0  ;;  %v1241_v33 = vpop.f32.mrf.mxu1  ;;  %v1271_v49 = vpack.i.bf16 %v345_v41, %v342_v39 }
  0xf1   :  { %v1256_v35 = vpack.i.bf16 %v1673_v28, %v1671_v27  ;;  %v217_v60 = vadd.f32 %v216_v31, %v1648_v0 }
  0xf2   :  { %v220_v37 = vpop.f32.mrf.mxu0  ;;  %v323_v38 = vpop.f32.mrf.mxu1 }
  0xf3   :  { %v1692_v40 = vadd.f32 %v220_v37, %v1642_v62  ;;  %1257 = vrot.lane.b32.xlu0 %v1256_v35, %s1372_s0  ;;  %v1697_v42 = vadd.f32 %v323_v38, %v1644_v63  ;;  %v1721_v11 = vmax.f32 %v217_v60, 0.0  ;;  %v642_v60 = vld [vmem:[%s2622_s3 + $0xe0] sm:$0xff] }
  0xf4   :  { %v222_v43 = vpop.f32.mrf.mxu0  ;;  %v1244_v44 = vpop.f32.mrf.mxu1 }
  0xf5   :  { %v223_v45 = vadd.f32 %v222_v43, %v1648_v0  ;;  %v351_v25 = vmax.f32 %v1697_v42, 0.0  ;;  %v702_v42 = vld [vmem:[%s2622_s3 + $0x2c0] sm:$0xff] }
  0xf6   :  { %v226_v47 = vpop.f32.mrf.mxu0  ;;  %v328_v48 = vpop.f32.mrf.mxu1 }
  0xf7   :  { %v227_v50 = vadd.f32 %v226_v47, %v1642_v62  ;;  %1262 = vrot.lane.b32.xlu0 %v1261_v46, %s1372_s0  ;;  %v1709_v51 = vadd.f32 %v328_v48, %v1644_v63  ;;  %v1735_v16 = vmax.f32 %v223_v45, 0.0 }
  0xf8   :  { %v228_v52 = vpop.f32.mrf.mxu0  ;;  %v1247_v53 = vpop.f32.mrf.mxu1 }
  0xf9   :  { %v229_v54 = vadd.f32 %v228_v52, %v1648_v0  ;;  %v354_v24 = vmax.f32 %v1709_v51, 0.0  ;;  %v1754_v45 = vmax.f32 %v227_v50, 0.0 }
  0xfa   :  { %v232_v55 = vpop.f32.mrf.mxu0  ;;  %v333_v59 = vpop.f32.mrf.mxu1 }
  0xfb   :  { %v233_v1 = vadd.f32 %v232_v55, %v1642_v62  ;;  %1272 = vrot.lane.b32.xlu0 %v1271_v49, %s1372_s0  ;;  %v1716_v2 = vadd.f32 %v333_v59, %v1644_v63  ;;  %v1718_v8 = vmax.f32 %v229_v54, 0.0  ;;  %v1762_v49 = vmax.f32 %v1651_v4, 0.0 }
  0xfc   :  { %v234_v6 = vpop.f32.mrf.mxu0  ;;  %v1250_v7 = vpop.f32.mrf.mxu1  ;;  %v348_v4 = vmax.f32 %v1682_v32, 0.0 }
  0xfd   :  { %v235_v10 = vadd.f32 %v234_v6, %v1648_v0  ;;  %v1723_v13 = vmax.f32 %v233_v1, 0.0  ;;  %v357_v31 = vmax.f32 %v1716_v2, 0.0  ;;  %v1291_v59 = vpack.i.bf16 %v1754_v45, %v1762_v49  ;;  %v641_v1 = vld [vmem:[%s2622_s3 + $0xd8] sm:$0xff] }
  0xfe   :  { %v1311_v6 = vpack.i.bf16 %v351_v25, %v348_v4 }
  0xff   :  { %v1725_v14 = vmax.f32 %v235_v10, 0.0  ;;  %v1296_v63 = vpack.i.bf16 %v1721_v11, %v1723_v13  ;;  %v1281_v47 = vpack.i.bf16 %v357_v31, %v354_v24 }
 0x101   :  { %v1286_v62 = vpack.i.bf16 %v1725_v14, %v1718_v8 }
 0x103   :  { %1287 = vrot.lane.b32.xlu0 %v1286_v62, %s1372_s0  ;;  %v640_v62 = vld [vmem:[%s2622_s3 + $0xd0] sm:$0xff] }
 0x107   :  { %1297 = vrot.lane.b32.xlu0 %v1296_v63, %s1372_s0  ;;  %v639_v63 = vld [vmem:[%s2622_s3 + $0xc8] sm:$0xff] }
 0x15d   :  { %v1733_v15 = vpop.permute.xlu1 %1267 }
 0x15e   :  { %v1270_v0 = vunpack.i.h.bf16 %v1733_v15  ;;  %v1269_v46 = vunpack.i.l.bf16 %v1733_v15 }
 0x160   :  { %v429_v17 = vmax.f32 %v1658_v12, %v1270_v0  ;;  %v464_v50 = vmax.f32 %v1658_v12, %v1269_v46  ;;  %v465_v54 = vmax.f32 %v339_v9, %v1269_v46  ;;  %v644_v9 = vld [vmem:[%s2622_s3 + $0xf0] sm:$0xff]  ;;  %v643_v12 = vld [vmem:[%s2622_s3 + $0xe8] sm:$0xff] }
 0x161   :  { %819 = vmatpush1.msra.mxu0 %v644_v9  ;;  %v624_v46 = vld [vmem:[%s2622_s3 + $0x50] sm:$0xff] }
 0x162   :  { %v1306_v18 = vpack.i.bf16 %v429_v17, %v1735_v16  ;;  %820 = vmatprep.subr.mxu0 %v643_v12  ;;  %v636_v17 = vld [vmem:[%s2622_s3 + $0xb0] sm:$0xff]  ;;  %v675_v12 = vld [vmem:[%s2622_s3 + $0x1e8] sm:$0xff] }
 0x163   :  { %821 = vmatpush1.msra.mxu0 %v642_v60  ;;  %v676_v9 = vld [vmem:[%s2622_s3 + $0x1f0] sm:$0xff]  ;;  %v674_v60 = vld [vmem:[%s2622_s3 + $0x1e0] sm:$0xff] }
 0x164   :  { %1307 = vrot.lane.b32.xlu0 %v1306_v18, %s1372_s0  ;;  %822 = vmatprep.subr.mxu0 %v641_v1  ;;  %v635_v18 = vld [vmem:[%s2622_s3 + $0xa8] sm:$0xff]  ;;  %v673_v1 = vld [vmem:[%s2622_s3 + $0x1d8] sm:$0xff] }
 0x165   :  { %v1258_v19 = vpop.permute.xlu0 %1257  ;;  %823 = vmatpush1.msra.mxu0 %v640_v62  ;;  %v669_v62 = vld [vmem:[%s2622_s3 + $0x1b8] sm:$0xff] }
 0x166   :  { %v1260_v20 = vunpack.i.h.bf16 %v1258_v19  ;;  %v1259_v21 = vunpack.i.l.bf16 %v1258_v19  ;;  %824 = vmatprep.subr.mxu0 %v639_v63  ;;  %v634_v19 = vld [vmem:[%s2622_s3 + $0xa0] sm:$0xff]  ;;  %v668_v63 = vld [vmem:[%s2622_s3 + $0x1b0] sm:$0xff] }
 0x168   :  { %v431_v22 = vmax.f32 %v1673_v28, %v1260_v20  ;;  %v430_v23 = vmax.f32 %v1671_v27, %v1259_v21 }
 0x169   :  { %v1263_v26 = vpop.permute.xlu0 %1262 }
 0x16a   :  { %v1265_v33 = vunpack.i.h.bf16 %v1263_v26  ;;  %v1264_v35 = vunpack.i.l.bf16 %v1263_v26  ;;  %v1276_v37 = vpack.i.bf16 %v431_v22, %v430_v23  ;;  %v631_v22 = vld [vmem:[%s2622_s3 + $0x88] sm:$0xff]  ;;  %v630_v23 = vld [vmem:[%s2622_s3 + $0x80] sm:$0xff]  ;;  %v629_v26 = vld [vmem:[%s2622_s3 + $0x78] sm:$0xff] }
 0x16c   :  { %v1748_v38 = vsel %vm400_vm3, %v1265_v33, %v1260_v20  ;;  %v1751_v43 = vsel %vm400_vm3, %v1264_v35, %v1259_v21  ;;  %1277 = vrot.lane.b32.xlu1 %v1276_v37, %s1372_s0  ;;  %v633_v20 = vld [vmem:[%s2622_s3 + $0x98] sm:$0xff]  ;;  %v632_v21 = vld [vmem:[%s2622_s3 + $0x90] sm:$0xff]  ;;  %v627_v35 = vld [vmem:[%s2622_s3 + $0x68] sm:$0xff] }
 0x16d   :  { %v1273_v44 = vpop.permute.xlu0 %1272  ;;  %v628_v33 = vld [vmem:[%s2622_s3 + $0x70] sm:$0xff]  ;;  %v626_v37 = vld [vmem:[%s2622_s3 + $0x60] sm:$0xff] }
 0x16e   :  { %v1274_v48 = vunpack.i.l.bf16 %v1273_v44 }
 0x170   :  { %v466_v52 = vmax.f32 %v1671_v27, %v1274_v48  ;;  %v467_v53 = vmax.f32 %v342_v39, %v1274_v48  ;;  %1282 = vrot.lane.b32.xlu1 %v1281_v47, %s1372_s0  ;;  %v1275_v27 = vunpack.i.h.bf16 %v1273_v44  ;;  %v1301_v39 = vpack.i.bf16 %v465_v54, %v464_v50  ;;  %v625_v44 = vld [vmem:[%s2622_s3 + $0x58] sm:$0xff]  ;;  %v623_v47 = vld [vmem:[%s2622_s3 + $0x48] sm:$0xff]  ;;  %v622_v48 = vld [vmem:[%s2622_s3 + $0x40] sm:$0xff] }
 0x171   :  { %v619_v50 = vld [vmem:[%s2622_s3 + $0x28] sm:$0xff]  ;;  %v618_v54 = vld [vmem:[%s2622_s3 + $0x20] sm:$0xff] }
 0x172   :  { %v1316_v55 = vpack.i.bf16 %v467_v53, %v466_v52  ;;  %v468_v7 = vmax.f32 %v1673_v28, %v1275_v27  ;;  %v469_v10 = vmax.f32 %v345_v41, %v1275_v27  ;;  %v638_v28 = vld [vmem:[%s2622_s3 + $0xc0] sm:$0xff]  ;;  %v621_v52 = vld [vmem:[%s2622_s3 + $0x38] sm:$0xff]  ;;  %v620_v53 = vld [vmem:[%s2622_s3 + $0x30] sm:$0xff] }
 0x173   :  { %825 = vmatpush1.msra.mxu0 %v638_v28  ;;  %v615_v27 = vld [vmem:[%s2622_s3 + $0x8] sm:$0xff] }
 0x174   :  { %1317 = vrot.lane.b32.xlu0 %v1316_v55, %s1373_s2  ;;  %1292 = vrot.lane.b32.xlu1 %v1291_v59, %s1372_s0  ;;  %v1321_v41 = vpack.i.bf16 %v469_v10, %v468_v7  ;;  %v617_v55 = vld [vmem:[%s2622_s3 + $0x18] sm:$0xff]  ;;  %v616_v59 = vld [vmem:[%s2622_s3 + $0x10] sm:$0xff] }
 0x175   :  { %826 = vmatprep.subr.mxu0 %v637_v30  ;;  %v671_v7 = vld [vmem:[%s2622_s3 + $0x1c8] sm:$0xff]  ;;  %v670_v10 = vld [vmem:[%s2622_s3 + $0x1c0] sm:$0xff] }
 0x176   :  { %827 = vmatpush1.msra.mxu0 %v636_v17  ;;  %v667_v28 = vld [vmem:[%s2622_s3 + $0x1a8] sm:$0xff]  ;;  %v666_v30 = vld [vmem:[%s2622_s3 + $0x1a0] sm:$0xff]  ;;  %v664_v17 = vld [vmem:[%s2622_s3 + $0x190] sm:$0xff] }
 0x177   :  { %828 = vmatprep.subr.mxu0 %v635_v18  ;;  %v663_v18 = vld [vmem:[%s2622_s3 + $0x188] sm:$0xff] }
 0x178   :  { %1302 = vrot.lane.b32.xlu1 %v1301_v39, %s1373_s2  ;;  %829 = vmatpush1.msra.mxu0 %v634_v19  ;;  %v614_v39 = vld [vmem:[%s2622_s3] sm:$0xff] }
 0x179   :  { %830 = vmatprep.subr.mxu0 %v633_v20  ;;  %v662_v19 = vld [vmem:[%s2622_s3 + $0x180] sm:$0xff]  ;;  %v661_v20 = vld [vmem:[%s2622_s3 + $0x178] sm:$0xff] }
 0x17a   :  { %831 = vmatpush1.msra.mxu0 %v632_v21  ;;  %v660_v21 = vld [vmem:[%s2622_s3 + $0x170] sm:$0xff] }
 0x17b   :  { %832 = vmatprep.subr.mxu0 %v631_v22  ;;  %v659_v22 = vld [vmem:[%s2622_s3 + $0x168] sm:$0xff] }
 0x17c   :  { %1312 = vrot.lane.b32.xlu1 %v1311_v6, %s1372_s0  ;;  %833 = vmatpush1.msra.mxu0 %v630_v23  ;;  %v672_v6 = vld [vmem:[%s2622_s3 + $0x1d0] sm:$0xff]  ;;  %v658_v23 = vld [vmem:[%s2622_s3 + $0x160] sm:$0xff] }
 0x17d   :  { %834 = vmatprep.subr.mxu0 %v629_v26  ;;  %v657_v26 = vld [vmem:[%s2622_s3 + $0x158] sm:$0xff] }
 0x17e   :  { %835 = vmatpush1.msra.mxu0 %v628_v33  ;;  %v656_v33 = vld [vmem:[%s2622_s3 + $0x150] sm:$0xff] }
 0x17f   :  { %836 = vmatprep.subr.mxu0 %v627_v35  ;;  %v655_v35 = vld [vmem:[%s2622_s3 + $0x148] sm:$0xff] }
 0x180   :  { %1322 = vrot.lane.b32.xlu1 %v1321_v41, %s1373_s2  ;;  %837 = vmatpush1.msra.mxu0 %v626_v37  ;;  %v665_v41 = vld [vmem:[%s2622_s3 + $0x198] sm:$0xff]  ;;  %v654_v37 = vld [vmem:[%s2622_s3 + $0x140] sm:$0xff] }
 0x181   :  { %838 = vmatprep.subr.mxu0 %v625_v44  ;;  %v653_v44 = vld [vmem:[%s2622_s3 + $0x138] sm:$0xff] }
 0x182   :  { %839 = vmatpush1.msra.mxu0 %v624_v46  ;;  %v652_v46 = vld [vmem:[%s2622_s3 + $0x130] sm:$0xff] }
 0x183   :  { %840 = vmatprep.subr.mxu0 %v623_v47  ;;  %v651_v47 = vld [vmem:[%s2622_s3 + $0x128] sm:$0xff] }
 0x184   :  { %841 = vmatpush1.msra.mxu0 %v622_v48  ;;  %v650_v48 = vld [vmem:[%s2622_s3 + $0x120] sm:$0xff] }
 0x185   :  { %842 = vmatprep.subr.mxu0 %v621_v52  ;;  %v649_v52 = vld [vmem:[%s2622_s3 + $0x118] sm:$0xff] }
 0x186   :  { %843 = vmatpush1.msra.mxu0 %v620_v53  ;;  %v648_v53 = vld [vmem:[%s2622_s3 + $0x110] sm:$0xff] }
 0x187   :  { %844 = vmatprep.subr.mxu0 %v619_v50  ;;  %v647_v50 = vld [vmem:[%s2622_s3 + $0x108] sm:$0xff] }
 0x188   :  { %845 = vmatpush1.msra.mxu0 %v618_v54  ;;  %v646_v54 = vld [vmem:[%s2622_s3 + $0x100] sm:$0xff] }
 0x189   :  { %846 = vmatprep.subr.mxu0 %v617_v55  ;;  %v1979_v55 = vpop.permute.xlu0 %1287 }
 0x18a   :  { %847 = vmatpush1.msra.mxu0 %v616_v59  ;;  %v417_v59 = vmax.f32 %v1684_v34, %v1748_v38 }
 0x18b   :  { %848 = vmatprep.subr.mxu0 %v615_v27  ;;  %v416_v27 = vmax.f32 %v1688_v36, %v1751_v43 }
 0x18c   :  { %849 = vmatpush1.msra.mxu0 %v614_v39 }
 0x18d   :  { %850 = vmatprep.subr.mxu0 %v677_v5 }
 0x18e   :  { %851 = vmatpush2.msra.mxu0 %v676_v9 }
 0x18f   :  { %852 = vmatprep.subr.mxu0 %v675_v12  ;;  %v565_v12 = vsel %vm563_vm4, %v1688_v36, %v416_v27  ;;  %v1289_v36 = vunpack.i.l.bf16 %v1979_v55 }
 0x190   :  { %853 = vmatpush2.msra.mxu0 %v674_v60  ;;  %v566_v60 = vsel %vm563_vm4, %v1684_v34, %v417_v59 }
 0x191   :  { %854 = vmatprep.subr.mxu0 %v673_v1  ;;  %v1993_v1 = vpop.permute.xlu0 %1297 }
 0x192   :  { %855 = vmatpush2.msra.mxu0 %v672_v6 }
 0x193   :  { %856 = vmatprep.subr.mxu0 %v671_v7 }
 0x194   :  { %857 = vmatpush2.msra.mxu0 %v670_v10  ;;  %v1290_v10 = vunpack.i.h.bf16 %v1979_v55 }
 0x195   :  { %858 = vmatprep.subr.mxu0 %v669_v62 }
 0x196   :  { %859 = vmatpush2.msra.mxu0 %v668_v63 }
 0x197   :  { %860 = vmatprep.subr.mxu0 %v667_v28 }
 0x198   :  { %861 = vmatpush2.msra.mxu0 %v666_v30 }
 0x199   :  { %862 = vmatprep.subr.mxu0 %v665_v41 }
 0x19a   :  { %863 = vmatpush2.msra.mxu0 %v664_v17 }
 0x19b   :  { %864 = vmatprep.subr.mxu0 %v663_v18 }
 0x19c   :  { %865 = vmatpush2.msra.mxu0 %v662_v19  ;;  %v2015_v19 = vmax.f32 %v1676_v29, 0.0 }
 0x19d   :  { %866 = vmatprep.subr.mxu0 %v661_v20  ;;  %v2018_v20 = vmax.f32 %v1692_v40, 0.0  ;;  %v1300_v40 = vunpack.i.h.bf16 %v1993_v1 }
 0x19e   :  { %867 = vmatpush2.msra.mxu0 %v660_v21  ;;  %v435_v21 = vmax.f32 %v1725_v14, %v1290_v10 }
 0x19f   :  { %868 = vmatprep.subr.mxu0 %v659_v22 }
 0x1a0   :  { %869 = vmatpush2.msra.mxu0 %v658_v23 }
 0x1a1   :  { %870 = vmatprep.subr.mxu0 %v657_v26 }
 0x1a2   :  { %871 = vmatpush2.msra.mxu0 %v656_v33 }
 0x1a3   :  { %872 = vmatprep.subr.mxu0 %v655_v35 }
 0x1a4   :  { %873 = vmatpush2.msra.mxu0 %v654_v37  ;;  %v1341_v37 = vpack.i.bf16 %v2018_v20, %v2015_v19 }
 0x1a5   :  { %874 = vmatprep.subr.mxu0 %v653_v44 }
 0x1a6   :  { %875 = vmatpush2.msra.mxu0 %v652_v46  ;;  %v709_v46 = vld [vmem:[%s2622_s3 + $0x2f8] sm:$0xff] }
 0x1a7   :  { %876 = vmatprep.subr.mxu0 %v651_v47  ;;  %v708_v47 = vld [vmem:[%s2622_s3 + $0x2f0] sm:$0xff]  ;;  %889 = vmatprep.subr.mxu1 %v709_v46  ;;  %v687_v46 = vld [vmem:[%s2622_s3 + $0x248] sm:$0xff] }
 0x1a8   :  { %877 = vmatpush2.msra.mxu0 %v650_v48  ;;  %v773_v48 = vld [vmem:[%s2622_s3 + $0x4f8] sm:$0xff]  ;;  %890 = vmatpush1.msra.mxu1 %v708_v47  ;;  %v686_v47 = vld [vmem:[%s2622_s3 + $0x240] sm:$0xff] }
 0x1a9   :  { %878 = vmatprep.subr.mxu0 %v649_v52 }
 0x1aa   :  { %879 = vmatpush2.msra.mxu0 %v648_v53 }
 0x1ab   :  { %880 = vmatprep.subr.mxu0 %v647_v50  ;;  %v432_v50 = vmax.f32 %v1721_v11, %v1300_v40 }
 0x1ac   :  { %881 = vmatpush2.msra.mxu0 %v646_v54 }
 0x1ad   :  { %960 = vmatprep.subr.mxu0 %v773_v48  ;;  %v685_v48 = vld [vmem:[%s2622_s3 + $0x238] sm:$0xff] }
 0x1d6   :  { %v2004_v34 = vpop.permute.xlu0 %1307 }
 0x1d7   :  { %v1309_v51 = vunpack.i.l.bf16 %v2004_v34  ;;  %v1310_v26 = vunpack.i.h.bf16 %v2004_v34 }
 0x1d9   :  { %v433_v15 = vmax.f32 %v1735_v16, %v1309_v51 }
 0x1de   :  { %v1985_v39 = vpop.permute.xlu1 %1277 }
 0x1df   :  { %v1280_v5 = vunpack.i.h.bf16 %v1985_v39  ;;  %v1279_v9 = vunpack.i.l.bf16 %v1985_v39  ;;  %v696_v39 = vld [vmem:[%s2622_s3 + $0x290] sm:$0xff] }
 0x1e1   :  { %v573_v38 = vsel %vm571_vm5, %v565_v12, %v1279_v9  ;;  %v574_v43 = vsel %vm571_vm5, %v566_v60, %v1280_v5  ;;  %v706_v60 = vld [vmem:[%s2622_s3 + $0x2e0] sm:$0xff] }
 0x1e2   :  { %v1283_v6 = vpop.permute.xlu1 %1282  ;;  %v587_v7 = vmax.f32 %v573_v38, %v574_v43 }
 0x1e3   :  { %v1285_v62 = vunpack.i.h.bf16 %v1283_v6  ;;  %v1284_v63 = vunpack.i.l.bf16 %v1283_v6  ;;  %v705_v6 = vld [vmem:[%s2622_s3 + $0x2d8] sm:$0xff] }
 0x1e4   :  { %595 = vrot.lane.b32.xlu0 %v587_v7, %s1374_s28  ;;  %v1346_v7 = vpack.i.bf16 %v433_v15, %v432_v50  ;;  %v690_v15 = vld [vmem:[%s2622_s3 + $0x260] sm:$0xff] }
 0x1e5   :  { %v476_v28 = vmax.f32 %v1725_v14, %v1285_v62  ;;  %v477_v30 = vmax.f32 %v357_v31, %v1285_v62  ;;  %v474_v41 = vmax.f32 %v1718_v8, %v1284_v63  ;;  %v475_v17 = vmax.f32 %v354_v24, %v1284_v63  ;;  %v704_v62 = vld [vmem:[%s2622_s3 + $0x2d0] sm:$0xff]  ;;  %v682_v50 = vld [vmem:[%s2622_s3 + $0x220] sm:$0xff] }
 0x1e6   :  { %v2012_v18 = vpop.permute.xlu1 %1292  ;;  %v434_v31 = vmax.f32 %v1718_v8, %v1289_v36  ;;  %v1318_v8 = vpop.permute.xlu0 %1317 }
 0x1e7   :  { %v1294_v2 = vunpack.i.l.bf16 %v2012_v18  ;;  %v1331_v24 = vpack.i.bf16 %v477_v30, %v476_v28  ;;  %v1326_v22 = vpack.i.bf16 %v475_v17, %v474_v41  ;;  %v1320_v54 = vunpack.i.h.bf16 %v1318_v8  ;;  %v703_v17 = vld [vmem:[%s2622_s3 + $0x2c8] sm:$0xff] }
 0x1e8   :  { %v1319_v59 = vunpack.i.l.bf16 %v1318_v8  ;;  %v697_v8 = vld [vmem:[%s2622_s3 + $0x298] sm:$0xff] }
 0x1e9   :  { %v401_v29 = vsel %vm400_vm3, %v1294_v2, %v1270_v0  ;;  %1332 = vrot.lane.b32.xlu0 %v1331_v24, %s1373_s2  ;;  %1327 = vrot.lane.b32.xlu1 %v1326_v22, %s1373_s2  ;;  %v1336_v0 = vpack.i.bf16 %v435_v21, %v434_v31  ;;  %v700_v31 = vld [vmem:[%s2622_s3 + $0x2b0] sm:$0xff]  ;;  %v699_v22 = vld [vmem:[%s2622_s3 + $0x2a8] sm:$0xff] }
 0x1ea   :  { %v415_v23 = vmax.f32 %v1762_v49, %v401_v29  ;;  %v1303_v14 = vpop.permute.xlu1 %1302  ;;  %v550_v21 = vsel %vm548_vm6, %v1319_v59, %v1320_v54  ;;  %v681_v54 = vld [vmem:[%s2622_s3 + $0x218] sm:$0xff]  ;;  %v680_v59 = vld [vmem:[%s2622_s3 + $0x210] sm:$0xff] }
 0x1eb   :  { %v1305_v33 = vunpack.i.h.bf16 %v1303_v14  ;;  %v1304_v35 = vunpack.i.l.bf16 %v1303_v14  ;;  %v2105_v29 = vsel %vm579_vm7, %v1279_v9, %v550_v21  ;;  %v698_v14 = vld [vmem:[%s2622_s3 + $0x2a0] sm:$0xff]  ;;  %v731_v21 = vld [vmem:[%s2622_s3 + $0x3a8] sm:$0xff] }
 0x1ec   :  { %v564_v44 = vsel %vm563_vm4, %v1762_v49, %v415_v23  ;;  %v707_v49 = vld [vmem:[%s2622_s3 + $0x2e8] sm:$0xff]  ;;  %v694_v9 = vld [vmem:[%s2622_s3 + $0x280] sm:$0xff] }
 0x1ed   :  { %v549_v52 = vsel %vm548_vm6, %v1304_v35, %v1305_v33  ;;  %v2054_v53 = vsel %vm571_vm5, %v564_v44, %v1310_v26  ;;  %1342 = vrot.lane.b32.xlu0 %v1341_v37, %s1372_s0  ;;  %1337 = vrot.lane.b32.xlu1 %v1336_v0, %s1372_s0  ;;  %v693_v33 = vld [vmem:[%s2622_s3 + $0x278] sm:$0xff]  ;;  %v692_v35 = vld [vmem:[%s2622_s3 + $0x270] sm:$0xff] }
 0x1ee   :  { %v1313_v27 = vpop.permute.xlu1 %1312  ;;  %v2065_v12 = vsel %vm579_vm7, %v1310_v26, %v549_v52  ;;  %891 = vmatprep.subr.mxu1 %v707_v49  ;;  %v691_v37 = vld [vmem:[%s2622_s3 + $0x268] sm:$0xff]  ;;  %v689_v0 = vld [vmem:[%s2622_s3 + $0x258] sm:$0xff]  ;;  %v688_v44 = vld [vmem:[%s2622_s3 + $0x250] sm:$0xff] }
 0x1ef   :  { %v1315_v38 = vunpack.i.h.bf16 %v1313_v27  ;;  %v1314_v43 = vunpack.i.l.bf16 %v1313_v27  ;;  %892 = vmatpush1.msra.mxu1 %v706_v60  ;;  %v684_v52 = vld [vmem:[%s2622_s3 + $0x230] sm:$0xff]  ;;  %v683_v49 = vld [vmem:[%s2622_s3 + $0x228] sm:$0xff]  ;;  %v678_v60 = vld [vmem:[%s2622_s3 + $0x200] sm:$0xff] }
 0x1f0   :  { %893 = vmatprep.subr.mxu1 %v705_v6  ;;  %v679_v27 = vld [vmem:[%s2622_s3 + $0x208] sm:$0xff] }
 0x1f1   :  { %v472_v63 = vmax.f32 %v1735_v16, %v1315_v38  ;;  %v473_v28 = vmax.f32 %v351_v25, %v1315_v38  ;;  %v470_v30 = vmax.f32 %v1721_v11, %v1314_v43  ;;  %v471_v41 = vmax.f32 %v348_v4, %v1314_v43  ;;  %1347 = vrot.lane.b32.xlu1 %v1346_v7, %s1372_s0  ;;  %v701_v4 = vld [vmem:[%s2622_s3 + $0x2b8] sm:$0xff]  ;;  %v740_v43 = vld [vmem:[%s2622_s3 + $0x3f0] sm:$0xff]  ;;  %v739_v6 = vld [vmem:[%s2622_s3 + $0x3e8] sm:$0xff] }
 0x1f2   :  { %v1323_v2 = vpop.permute.xlu1 %1322  ;;  %894 = vmatpush1.msra.mxu1 %v704_v62  ;;  %v741_v38 = vld [vmem:[%s2622_s3 + $0x3f8] sm:$0xff]  ;;  %v738_v7 = vld [vmem:[%s2622_s3 + $0x3e0] sm:$0xff] }
 0x1f3   :  { %v1325_v16 = vunpack.i.h.bf16 %v1323_v2  ;;  %v1324_v11 = vunpack.i.l.bf16 %v1323_v2  ;;  %v1356_v25 = vpack.i.bf16 %v473_v28, %v472_v63  ;;  %v1351_v32 = vpack.i.bf16 %v471_v41, %v470_v30  ;;  %895 = vmatprep.subr.mxu1 %v703_v17  ;;  %v737_v62 = vld [vmem:[%s2622_s3 + $0x3d8] sm:$0xff]  ;;  %v736_v63 = vld [vmem:[%s2622_s3 + $0x3d0] sm:$0xff]  ;;  %v735_v28 = vld [vmem:[%s2622_s3 + $0x3c8] sm:$0xff] }
 0x1f4   :  { %896 = vmatpush1.msra.mxu1 %v702_v42  ;;  %v734_v30 = vld [vmem:[%s2622_s3 + $0x3c0] sm:$0xff]  ;;  %v733_v41 = vld [vmem:[%s2622_s3 + $0x3b8] sm:$0xff]  ;;  %v732_v17 = vld [vmem:[%s2622_s3 + $0x3b0] sm:$0xff] }
 0x1f5   :  { %v551_v24 = vsel %vm548_vm6, %v1324_v11, %v1325_v16  ;;  %1352 = vrot.lane.b32.xlu0 %v1351_v32, %s1373_s2  ;;  %1357 = vrot.lane.b32.xlu1 %v1356_v25, %s1373_s2  ;;  %v730_v2 = vld [vmem:[%s2622_s3 + $0x3a0] sm:$0xff]  ;;  %v729_v42 = vld [vmem:[%s2622_s3 + $0x398] sm:$0xff] }
 0x1f6   :  { %v2110_v23 = vsel %vm579_vm7, %v1280_v5, %v551_v24  ;;  %897 = vmatprep.subr.mxu1 %v701_v4  ;;  %v695_v5 = vld [vmem:[%s2622_s3 + $0x288] sm:$0xff]  ;;  %v728_v16 = vld [vmem:[%s2622_s3 + $0x390] sm:$0xff]  ;;  %v726_v25 = vld [vmem:[%s2622_s3 + $0x380] sm:$0xff] }
 0x1f7   :  { %v588_v26 = vmax.f32 %v2105_v29, %v2110_v23  ;;  %898 = vmatpush1.msra.mxu1 %v700_v31  ;;  %v727_v11 = vld [vmem:[%s2622_s3 + $0x388] sm:$0xff]  ;;  %v725_v32 = vld [vmem:[%s2622_s3 + $0x378] sm:$0xff]  ;;  %v724_v4 = vld [vmem:[%s2622_s3 + $0x370] sm:$0xff] }
 0x1f8   :  { %899 = vmatprep.subr.mxu1 %v699_v22  ;;  %v723_v31 = vld [vmem:[%s2622_s3 + $0x368] sm:$0xff]  ;;  %v722_v24 = vld [vmem:[%s2622_s3 + $0x360] sm:$0xff]  ;;  %v721_v22 = vld [vmem:[%s2622_s3 + $0x358] sm:$0xff] }
 0x1f9   :  { %900 = vmatpush1.msra.mxu1 %v698_v14  ;;  %v720_v14 = vld [vmem:[%s2622_s3 + $0x350] sm:$0xff] }
 0x1fa   :  { %901 = vmatprep.subr.mxu1 %v697_v8  ;;  %v719_v8 = vld [vmem:[%s2622_s3 + $0x348] sm:$0xff] }
 0x1fb   :  { %902 = vmatpush1.msra.mxu1 %v696_v39  ;;  %v718_v39 = vld [vmem:[%s2622_s3 + $0x340] sm:$0xff] }
 0x1fc   :  { %903 = vmatprep.subr.mxu1 %v695_v5  ;;  %v717_v5 = vld [vmem:[%s2622_s3 + $0x338] sm:$0xff] }
 0x1fd   :  { %904 = vmatpush1.msra.mxu1 %v694_v9  ;;  %v716_v9 = vld [vmem:[%s2622_s3 + $0x330] sm:$0xff] }
 0x1fe   :  { %905 = vmatprep.subr.mxu1 %v693_v33  ;;  %v715_v33 = vld [vmem:[%s2622_s3 + $0x328] sm:$0xff] }
 0x1ff   :  { %906 = vmatpush1.msra.mxu1 %v692_v35  ;;  %v1299_v35 = vunpack.i.l.bf16 %v1993_v1 }
 0x200   :  { %907 = vmatprep.subr.mxu1 %v691_v37  ;;  %v1295_v37 = vunpack.i.h.bf16 %v2012_v18  ;;  %v770_v18 = vld [vmem:[%s2622_s3 + $0x4e0] sm:$0xff] }
 0x201   :  { %908 = vmatpush1.msra.mxu1 %v690_v15 }
 0x202   :  { %909 = vmatprep.subr.mxu1 %v689_v0 }
 0x203   :  { %910 = vmatpush1.msra.mxu1 %v688_v44  ;;  %v772_v44 = vld [vmem:[%s2622_s3 + $0x4f0] sm:$0xff] }
 0x204   :  { %911 = vmatprep.subr.mxu1 %v687_v46  ;;  %v771_v46 = vld [vmem:[%s2622_s3 + $0x4e8] sm:$0xff] }
 0x205   :  { %912 = vmatpush1.msra.mxu1 %v686_v47  ;;  %v714_v47 = vld [vmem:[%s2622_s3 + $0x320] sm:$0xff] }
 0x206   :  { %913 = vmatprep.subr.mxu1 %v685_v48  ;;  %v407_v48 = vsel %vm400_vm3, %v1299_v35, %v1290_v10  ;;  %v712_v10 = vld [vmem:[%s2622_s3 + $0x310] sm:$0xff] }
 0x207   :  { %914 = vmatpush1.msra.mxu1 %v684_v52  ;;  %v769_v52 = vld [vmem:[%s2622_s3 + $0x4d8] sm:$0xff] }
 0x208   :  { %915 = vmatprep.subr.mxu1 %v683_v49  ;;  %v768_v49 = vld [vmem:[%s2622_s3 + $0x4d0] sm:$0xff] }
 0x209   :  { %916 = vmatpush1.msra.mxu1 %v682_v50 }
 0x20a   :  { %917 = vmatprep.subr.mxu1 %v681_v54  ;;  %v711_v54 = vld [vmem:[%s2622_s3 + $0x308] sm:$0xff] }
 0x20b   :  { %918 = vmatpush1.msra.mxu1 %v680_v59  ;;  %v710_v59 = vld [vmem:[%s2622_s3 + $0x300] sm:$0xff] }
 0x20c   :  { %919 = vmatprep.subr.mxu1 %v679_v27  ;;  %v421_v27 = vmax.f32 %v1723_v13, %v407_v48 }
 0x20d   :  { %920 = vmatpush1.msra.mxu1 %v678_v60 }
 0x20e   :  { %921 = vmatprep.subr.mxu1 %v741_v38  ;;  %v766_v38 = vld [vmem:[%s2622_s3 + $0x4c0] sm:$0xff] }
 0x20f   :  { %922 = vmatpush2.msra.mxu1 %v740_v43 }
 0x210   :  { %923 = vmatprep.subr.mxu1 %v739_v6 }
 0x211   :  { %924 = vmatpush2.msra.mxu1 %v738_v7 }
 0x212   :  { %925 = vmatprep.subr.mxu1 %v737_v62 }
 0x213   :  { %926 = vmatpush2.msra.mxu1 %v736_v63  ;;  %v765_v63 = vld [vmem:[%s2622_s3 + $0x4b8] sm:$0xff] }
 0x214   :  { %927 = vmatprep.subr.mxu1 %v735_v28  ;;  %v764_v28 = vld [vmem:[%s2622_s3 + $0x4b0] sm:$0xff] }
 0x215   :  { %928 = vmatpush2.msra.mxu1 %v734_v30 }
 0x216   :  { %929 = vmatprep.subr.mxu1 %v733_v41 }
 0x217   :  { %930 = vmatpush2.msra.mxu1 %v732_v17  ;;  %v763_v17 = vld [vmem:[%s2622_s3 + $0x4a8] sm:$0xff] }
 0x218   :  { %931 = vmatprep.subr.mxu1 %v731_v21 }
 0x219   :  { %932 = vmatpush2.msra.mxu1 %v730_v2 }
 0x21a   :  { %933 = vmatprep.subr.mxu1 %v729_v42 }
 0x21b   :  { %934 = vmatpush2.msra.mxu1 %v728_v16 }
 0x21c   :  { %935 = vmatprep.subr.mxu1 %v727_v11  ;;  %v762_v11 = vld [vmem:[%s2622_s3 + $0x4a0] sm:$0xff] }
 0x21d   :  { %936 = vmatpush2.msra.mxu1 %v726_v25 }
 0x21e   :  { %937 = vmatprep.subr.mxu1 %v725_v32 }
 0x21f   :  { %938 = vmatpush2.msra.mxu1 %v724_v4  ;;  %v570_v4 = vsel %vm563_vm4, %v1723_v13, %v421_v27  ;;  %v752_v27 = vld [vmem:[%s2622_s3 + $0x450] sm:$0xff] }
 0x220   :  { %939 = vmatprep.subr.mxu1 %v723_v31 }
 0x221   :  { %940 = vmatpush2.msra.mxu1 %v722_v24  ;;  %v761_v24 = vld [vmem:[%s2622_s3 + $0x498] sm:$0xff] }
 0x222   :  { %941 = vmatprep.subr.mxu1 %v721_v22 }
 0x223   :  { %942 = vmatpush2.msra.mxu1 %v720_v14 }
 0x224   :  { %943 = vmatprep.subr.mxu1 %v719_v8 }
 0x225   :  { %944 = vmatpush2.msra.mxu1 %v718_v39 }
 0x226   :  { %945 = vmatprep.subr.mxu1 %v717_v5 }
 0x227   :  { %946 = vmatpush2.msra.mxu1 %v716_v9 }
 0x228   :  { %947 = vmatprep.subr.mxu1 %v715_v33 }
 0x229   :  { %948 = vmatpush2.msra.mxu1 %v714_v47 }
 0x256   :  { %v2260_v15 = vpop.permute.xlu0 %595 }
 0x257   :  { %v612_v0 = vsel %vm599_vm8, %v2065_v12, %v2260_v15  ;;  %v713_v12 = vld [vmem:[%s2622_s3 + $0x318] sm:$0xff] }
 0x258   :  { %882 = vmatprep.mubr.f32.mxu0 %v612_v0  ;;  %949 = vmatprep.subr.mxu1 %v713_v12  ;;  %v758_v0 = vld [vmem:[%s2622_s3 + $0x480] sm:$0xff] }
 0x259   :  { %883 = vmatmul.mubr.f32.vlgmr.msra.gmra.mxu0 %v2054_v53  ;;  %v406_v53 = vsel %vm400_vm3, %v1295_v37, %v1289_v36  ;;  %v767_v36 = vld [vmem:[%s2622_s3 + $0x4c8] sm:$0xff]  ;;  %950 = vmatpush2.msra.mxu1 %v712_v10 }
 0x25a   :  { %961 = vmatpush1.msra.mxu0 %v772_v44  ;;  %v420_v60 = vmax.f32 %v1754_v45, %v406_v53  ;;  %951 = vmatprep.subr.mxu1 %v711_v54 }
 0x25b   :  { %962 = vmatprep.subr.mxu0 %v771_v46  ;;  %v1333_v50 = vpop.permute.xlu0 %1332  ;;  %v1328_v55 = vpop.permute.xlu1 %1327  ;;  %952 = vmatpush2.msra.mxu1 %v710_v59 }
 0x25c   :  { %963 = vmatpush1.msra.mxu0 %v770_v18  ;;  %v1335_v43 = vunpack.i.h.bf16 %v1333_v50  ;;  %v1334_v6 = vunpack.i.l.bf16 %v1333_v50  ;;  %v1330_v7 = vunpack.i.h.bf16 %v1328_v55  ;;  %v1329_v62 = vunpack.i.l.bf16 %v1328_v55  ;;  %1063 = vmatprep.subr.mxu1 %v1370_v3  ;;  %v757_v18 = vld [vmem:[%s2622_s3 + $0x478] sm:$0xff]  ;;  %v755_v50 = vld [vmem:[%s2622_s3 + $0x468] sm:$0xff] }
 0x25d   :  { %964 = vmatprep.subr.mxu0 %v769_v52  ;;  %v569_v31 = vsel %vm563_vm4, %v1754_v45, %v420_v60  ;;  %v760_v45 = vld [vmem:[%s2622_s3 + $0x490] sm:$0xff] }
 0x25e   :  { %965 = vmatpush1.msra.mxu0 %v768_v49  ;;  %v555_v25 = vsel %vm548_vm6, %v1334_v6, %v1335_v43  ;;  %v554_v32 = vsel %vm548_vm6, %v1329_v62, %v1330_v7  ;;  %v750_v43 = vld [vmem:[%s2622_s3 + $0x440] sm:$0xff]  ;;  %v749_v7 = vld [vmem:[%s2622_s3 + $0x438] sm:$0xff]  ;;  %v748_v62 = vld [vmem:[%s2622_s3 + $0x430] sm:$0xff] }
 0x25f   :  { %966 = vmatprep.subr.mxu0 %v767_v36  ;;  %v1343_v30 = vpop.permute.xlu0 %1342  ;;  %v1338_v41 = vpop.permute.xlu1 %1337  ;;  %v753_v36 = vld [vmem:[%s2622_s3 + $0x458] sm:$0xff] }
 0x260   :  { %967 = vmatpush1.msra.mxu0 %v766_v38  ;;  %v1345_v21 = vunpack.i.h.bf16 %v1343_v30  ;;  %v1344_v2 = vunpack.i.l.bf16 %v1343_v30  ;;  %v1340_v42 = vunpack.i.h.bf16 %v1338_v41  ;;  %v1339_v16 = vunpack.i.l.bf16 %v1338_v41  ;;  %v751_v38 = vld [vmem:[%s2622_s3 + $0x448] sm:$0xff]  ;;  %v745_v30 = vld [vmem:[%s2622_s3 + $0x418] sm:$0xff]  ;;  %v744_v41 = vld [vmem:[%s2622_s3 + $0x410] sm:$0xff] }
 0x261   :  { %968 = vmatprep.subr.mxu0 %v765_v63  ;;  %v747_v63 = vld [vmem:[%s2622_s3 + $0x428] sm:$0xff] }
 0x262   :  { %969 = vmatpush1.msra.mxu0 %v764_v28  ;;  %v404_v22 = vsel %vm400_vm3, %v1344_v2, %v1300_v40  ;;  %v405_v14 = vsel %vm400_vm3, %v1345_v21, %v1309_v51  ;;  %v578_v8 = vsel %vm571_vm5, %v570_v4, %v1340_v42  ;;  %v577_v13 = vsel %vm571_vm5, %v569_v31, %v1339_v16  ;;  %v759_v51 = vld [vmem:[%s2622_s3 + $0x488] sm:$0xff]  ;;  %v746_v28 = vld [vmem:[%s2622_s3 + $0x420] sm:$0xff]  ;;  %v805_v2 = vld [vmem:[%s2622_s3 + $0x5f8] sm:$0xff] }
 0x263   :  { %970 = vmatprep.subr.mxu0 %v763_v17  ;;  %v418_v39 = vmax.f32 %v2015_v19, %v404_v22  ;;  %v419_v5 = vmax.f32 %v2018_v20, %v405_v14  ;;  %v1348_v1 = vpop.permute.xlu1 %1347  ;;  %v585_v40 = vsel %vm579_vm7, %v1339_v16, %v554_v32  ;;  %v586_v34 = vsel %vm579_vm7, %v1340_v42, %v555_v25  ;;  %v743_v17 = vld [vmem:[%s2622_s3 + $0x408] sm:$0xff]  ;;  %v742_v21 = vld [vmem:[%s2622_s3 + $0x400] sm:$0xff]  ;;  %v804_v42 = vld [vmem:[%s2622_s3 + $0x5f0] sm:$0xff] }
 0x264   :  { %971 = vmatpush1.msra.mxu0 %v762_v11  ;;  %v1350_v9 = vunpack.i.h.bf16 %v1348_v1  ;;  %v1349_v33 = vunpack.i.l.bf16 %v1348_v1  ;;  %v592_v35 = vmax.f32 %v585_v40, %v586_v34  ;;  %v591_v37 = vmax.f32 %v577_v13, %v578_v8  ;;  %v803_v16 = vld [vmem:[%s2622_s3 + $0x5e8] sm:$0xff]  ;;  %v802_v11 = vld [vmem:[%s2622_s3 + $0x5e0] sm:$0xff]  ;;  %v801_v25 = vld [vmem:[%s2622_s3 + $0x5d8] sm:$0xff] }
 0x265   :  { %972 = vmatprep.subr.mxu0 %v761_v24  ;;  %v567_v44 = vsel %vm563_vm4, %v2015_v19, %v418_v39  ;;  %v568_v46 = vsel %vm563_vm4, %v2018_v20, %v419_v5  ;;  %v756_v19 = vld [vmem:[%s2622_s3 + $0x470] sm:$0xff]  ;;  %v799_v4 = vld [vmem:[%s2622_s3 + $0x5c8] sm:$0xff]  ;;  %v798_v31 = vld [vmem:[%s2622_s3 + $0x5c0] sm:$0xff] }
 0x266   :  { %973 = vmatpush1.msra.mxu0 %v760_v45  ;;  %607 = vrot.lane.b32.xlu1 %v592_v35, %s1374_s28  ;;  %v1361_v12 = vpack.i.bf16 %v591_v37, %v588_v26  ;;  %v575_v48 = vsel %vm571_vm5, %v567_v44, %v1349_v33  ;;  %v576_v53 = vsel %vm571_vm5, %v568_v46, %v1350_v9  ;;  %v754_v26 = vld [vmem:[%s2622_s3 + $0x460] sm:$0xff]  ;;  %v800_v32 = vld [vmem:[%s2622_s3 + $0x5d0] sm:$0xff]  ;;  %v797_v24 = vld [vmem:[%s2622_s3 + $0x5b8] sm:$0xff] }
 0x267   :  { %v1353_v47 = vpop.permute.xlu0 %1352  ;;  %974 = vmatprep.subr.mxu0 %v759_v51  ;;  %v1358_v20 = vpop.permute.xlu1 %1357  ;;  %v589_v10 = vmax.f32 %v575_v48, %v576_v53  ;;  %v796_v22 = vld [vmem:[%s2622_s3 + $0x5b0] sm:$0xff]  ;;  %v795_v14 = vld [vmem:[%s2622_s3 + $0x5a8] sm:$0xff]  ;;  %v794_v8 = vld [vmem:[%s2622_s3 + $0x5a0] sm:$0xff] }
 0x268   :  { %v1355_v52 = vunpack.i.h.bf16 %v1353_v47  ;;  %v1354_v49 = vunpack.i.l.bf16 %v1353_v47  ;;  %975 = vmatpush1.msra.mxu0 %v758_v0  ;;  %v1360_v29 = vunpack.i.h.bf16 %v1358_v20  ;;  %v1359_v23 = vunpack.i.l.bf16 %v1358_v20  ;;  %1362 = vrot.lane.b32.xlu0 %v1361_v12, %s1374_s28  ;;  %v793_v13 = vld [vmem:[%s2622_s3 + $0x598] sm:$0xff]  ;;  %v792_v45 = vld [vmem:[%s2622_s3 + $0x590] sm:$0xff]  ;;  %v791_v39 = vld [vmem:[%s2622_s3 + $0x588] sm:$0xff] }
 0x269   :  { %976 = vmatprep.subr.mxu0 %v757_v18  ;;  %953 = vmatprep.mubr.f32.mxu1 %v589_v10  ;;  %v790_v5 = vld [vmem:[%s2622_s3 + $0x580] sm:$0xff]  ;;  %v789_v1 = vld [vmem:[%s2622_s3 + $0x578] sm:$0xff]  ;;  %v788_v40 = vld [vmem:[%s2622_s3 + $0x570] sm:$0xff] }
 0x26a   :  { %v552_v55 = vsel %vm548_vm6, %v1354_v49, %v1355_v52  ;;  %977 = vmatpush1.msra.mxu0 %v756_v19  ;;  %v553_v54 = vsel %vm548_vm6, %v1359_v23, %v1360_v29  ;;  %v787_v34 = vld [vmem:[%s2622_s3 + $0x568] sm:$0xff]  ;;  %v786_v51 = vld [vmem:[%s2622_s3 + $0x560] sm:$0xff]  ;;  %v781_v0 = vld [vmem:[%s2622_s3 + $0x538] sm:$0xff] }
 0x26b   :  { %v2382_v59 = vsel %vm579_vm7, %v1349_v33, %v552_v55  ;;  %978 = vmatprep.subr.mxu0 %v755_v50  ;;  %v2388_v60 = vsel %vm579_vm7, %v1350_v9, %v553_v54  ;;  %v785_v9 = vld [vmem:[%s2622_s3 + $0x558] sm:$0xff]  ;;  %v784_v33 = vld [vmem:[%s2622_s3 + $0x550] sm:$0xff]  ;;  %v783_v35 = vld [vmem:[%s2622_s3 + $0x548] sm:$0xff] }
 0x26c   :  { %979 = vmatpush1.msra.mxu0 %v754_v26  ;;  %v590_v6 = vmax.f32 %v2382_v59, %v2388_v60  ;;  %v782_v37 = vld [vmem:[%s2622_s3 + $0x540] sm:$0xff]  ;;  %v780_v44 = vld [vmem:[%s2622_s3 + $0x530] sm:$0xff]  ;;  %v779_v46 = vld [vmem:[%s2622_s3 + $0x528] sm:$0xff] }
 0x26d   :  { %980 = vmatprep.subr.mxu0 %v753_v36  ;;  %v778_v18 = vld [vmem:[%s2622_s3 + $0x520] sm:$0xff]  ;;  %v777_v47 = vld [vmem:[%s2622_s3 + $0x518] sm:$0xff]  ;;  %v776_v12 = vld [vmem:[%s2622_s3 + $0x510] sm:$0xff] }
 0x26e   :  { %981 = vmatpush1.msra.mxu0 %v752_v27  ;;  %v775_v48 = vld [vmem:[%s2622_s3 + $0x508] sm:$0xff]  ;;  %v774_v53 = vld [vmem:[%s2622_s3 + $0x500] sm:$0xff]  ;;  %v1048_v10 = vld [vmem:[%s2623_s5 + $0x78] sm:$0xff] }
 0x26f   :  { %982 = vmatprep.subr.mxu0 %v751_v38  ;;  %v1047_v26 = vld [vmem:[%s2623_s5 + $0x70] sm:$0xff]  ;;  %v1045_v55 = vld [vmem:[%s2623_s5 + $0x60] sm:$0xff]  ;;  %v1044_v36 = vld [vmem:[%s2623_s5 + $0x58] sm:$0xff] }
 0x270   :  { %983 = vmatpush1.msra.mxu0 %v750_v43  ;;  %v1043_v54 = vld [vmem:[%s2623_s5 + $0x50] sm:$0xff]  ;;  %v1042_v59 = vld [vmem:[%s2623_s5 + $0x48] sm:$0xff]  ;;  %v1041_v27 = vld [vmem:[%s2623_s5 + $0x40] sm:$0xff] }
 0x271   :  { %984 = vmatprep.subr.mxu0 %v749_v7  ;;  %v1040_v60 = vld [vmem:[%s2623_s5 + $0x38] sm:$0xff]  ;;  %v1039_v38 = vld [vmem:[%s2623_s5 + $0x30] sm:$0xff]  ;;  %v1038_v43 = vld [vmem:[%s2623_s5 + $0x28] sm:$0xff] }
 0x272   :  { %985 = vmatpush1.msra.mxu0 %v748_v62  ;;  %v1036_v7 = vld [vmem:[%s2623_s5 + $0x18] sm:$0xff]  ;;  %v1035_v62 = vld [vmem:[%s2623_s5 + $0x10] sm:$0xff] }
 0x273   :  { %986 = vmatprep.subr.mxu0 %v747_v63  ;;  %v1034_v63 = vld [vmem:[%s2623_s5 + $0x8] sm:$0xff] }
 0x274   :  { %987 = vmatpush1.msra.mxu0 %v746_v28  ;;  %v1033_v28 = vld [vmem:[%s2623_s5] sm:$0xff] }
 0x275   :  { %988 = vmatprep.subr.mxu0 %v745_v30  ;;  %v1052_v30 = vld [vmem:[%s2623_s5 + $0x98] sm:$0xff] }
 0x276   :  { %989 = vmatpush1.msra.mxu0 %v744_v41  ;;  %v1051_v41 = vld [vmem:[%s2623_s5 + $0x90] sm:$0xff] }
 0x277   :  { %990 = vmatprep.subr.mxu0 %v743_v17  ;;  %v1050_v17 = vld [vmem:[%s2623_s5 + $0x88] sm:$0xff] }
 0x278   :  { %991 = vmatpush1.msra.mxu0 %v742_v21  ;;  %v1049_v21 = vld [vmem:[%s2623_s5 + $0x80] sm:$0xff] }
 0x279   :  { %992 = vmatprep.subr.mxu0 %v805_v2  ;;  %v806_v2 = vld [vmem:[%s2624_s4] sm:$0x3] }
 0x27a   :  { %993 = vmatpush2.msra.mxu0 %v804_v42 }
 0x27b   :  { %994 = vmatprep.subr.mxu0 %v803_v16  ;;  %v811_v16 = vrot.slane %v806_v2, %v85_v58  ;;  %v1134_v58 = vand.u32 127, %v83_v56 }
 0x27c   :  { %995 = vmatpush2.msra.mxu0 %v802_v11  ;;  %v815_v11 = vrot.slane %v806_v2, %v89_v61 }
 0x27d   :  { %996 = vmatprep.subr.mxu0 %v801_v25  ;;  %vm1135_vm9 = vcmp.lt.s32.totalorder %v1134_v58, 82  ;;  %vm1148_vm10 = vcmp.eq.s32.totalorder %v1134_v58, 82 }
 0x27e   :  { %997 = vmatpush2.msra.mxu0 %v800_v32 }
 0x27f   :  { %998 = vmatprep.subr.mxu0 %v799_v4 }
 0x280   :  { %999 = vmatpush2.msra.mxu0 %v798_v31 }
 0x281   :  { %1000 = vmatprep.subr.mxu0 %v797_v24 }
 0x282   :  { %1001 = vmatpush2.msra.mxu0 %v796_v22 }
 0x283   :  { %1002 = vmatprep.subr.mxu0 %v795_v14 }
 0x284   :  { %1003 = vmatpush2.msra.mxu0 %v794_v8 }
 0x285   :  { %1004 = vmatprep.subr.mxu0 %v793_v13 }
 0x286   :  { %1005 = vmatpush2.msra.mxu0 %v792_v45 }
 0x287   :  { %1006 = vmatprep.subr.mxu0 %v791_v39 }
 0x288   :  { %1007 = vmatpush2.msra.mxu0 %v790_v5 }
 0x289   :  { %1008 = vmatprep.subr.mxu0 %v789_v1 }
 0x28a   :  { %1009 = vmatpush2.msra.mxu0 %v788_v40 }
 0x28b   :  { %1010 = vmatprep.subr.mxu0 %v787_v34 }
 0x28c   :  { %1011 = vmatpush2.msra.mxu0 %v786_v51 }
 0x28d   :  { %1012 = vmatprep.subr.mxu0 %v785_v9 }
 0x28e   :  { %1013 = vmatpush2.msra.mxu0 %v784_v33 }
 0x28f   :  { %1014 = vmatprep.subr.mxu0 %v783_v35 }
 0x290   :  { %1015 = vmatpush2.msra.mxu0 %v782_v37 }
 0x291   :  { %1016 = vmatprep.subr.mxu0 %v781_v0 }
 0x292   :  { %1017 = vmatpush2.msra.mxu0 %v780_v44 }
 0x293   :  { %1018 = vmatprep.subr.mxu0 %v779_v46 }
 0x294   :  { %1019 = vmatpush2.msra.mxu0 %v778_v18 }
 0x295   :  { %1020 = vmatprep.subr.mxu0 %v777_v47 }
 0x296   :  { %1021 = vmatpush2.msra.mxu0 %v776_v12 }
 0x297   :  { %1022 = vmatprep.subr.mxu0 %v775_v48 }
 0x298   :  { %1023 = vmatpush2.msra.mxu0 %v774_v53 }
 0x2d8   :  { %v608_v49 = vpop.permute.xlu1 %607 }
 0x2da   :  { %v1363_v19 = vpop.permute.xlu0 %1362 }
 0x2db   :  { %v1365_v20 = vunpack.i.h.bf16 %v1363_v19  ;;  %v1364_v52 = vunpack.i.l.bf16 %v1363_v19 }
 0x2dd   :  { %v600_v50 = vsel %vm599_vm8, %v2260_v15, %v1364_v52  ;;  %v609_v29 = vsel %vm599_vm8, %v1365_v20, %v608_v49  ;;  %v613_v23 = vsel %vm599_vm8, %v590_v6, %v1365_v20  ;;  %v1046_v15 = vld [vmem:[%s2623_s5 + $0x68] sm:$0xff]  ;;  %v1037_v6 = vld [vmem:[%s2623_s5 + $0x20] sm:$0xff] }
 0x2de   :  { %954 = vmatmul.mubr.f32.vlgmr.msra.gmra.mxu1 %v600_v50  ;;  %1024 = vmatprep.mubr.f32.mxu0 %v609_v29 }
 0x2df   :  { %1025 = vmatmul.mubr.f32.vlgmr.msra.gmra.mxu0 %v613_v23  ;;  %1064 = vmatpush1.msra.mxu1 %v1048_v10 }
 0x2e0   :  { %1065 = vmatprep.subr.mxu1 %v1370_v3 }
 0x2e1   :  { %1066 = vmatpush1.msra.mxu1 %v1047_v26 }
 0x2e2   :  { %1067 = vmatprep.subr.mxu1 %v1370_v3 }
 0x2e3   :  { %1068 = vmatpush1.msra.mxu1 %v1046_v15 }
 0x2e4   :  { %1069 = vmatprep.subr.mxu1 %v1370_v3 }
 0x2e5   :  { %1070 = vmatpush1.msra.mxu1 %v1045_v55 }
 0x2e6   :  { %1071 = vmatprep.subr.mxu1 %v1370_v3 }
 0x2e7   :  { %1072 = vmatpush1.msra.mxu1 %v1044_v36 }
 0x2e8   :  { %1073 = vmatprep.subr.mxu1 %v1370_v3 }
 0x2e9   :  { %1074 = vmatpush1.msra.mxu1 %v1043_v54 }
 0x2ea   :  { %1075 = vmatprep.subr.mxu1 %v1370_v3 }
 0x2eb   :  { %1076 = vmatpush1.msra.mxu1 %v1042_v59 }
 0x2ec   :  { %1077 = vmatprep.subr.mxu1 %v1370_v3 }
 0x2ed   :  { %1078 = vmatpush1.msra.mxu1 %v1041_v27 }
 0x2ee   :  { %1079 = vmatprep.subr.mxu1 %v1370_v3 }
 0x2ef   :  { %1080 = vmatpush1.msra.mxu1 %v1040_v60 }
 0x2f0   :  { %1081 = vmatprep.subr.mxu1 %v1370_v3 }
 0x2f1   :  { %1082 = vmatpush1.msra.mxu1 %v1039_v38 }
 0x2f2   :  { %1083 = vmatprep.subr.mxu1 %v1370_v3 }
 0x2f3   :  { %1084 = vmatpush1.msra.mxu1 %v1038_v43 }
 0x2f4   :  { %1085 = vmatprep.subr.mxu1 %v1370_v3 }
 0x2f5   :  { %1086 = vmatpush1.msra.mxu1 %v1037_v6 }
 0x2f6   :  { %1087 = vmatprep.subr.mxu1 %v1370_v3 }
 0x2f7   :  { %1088 = vmatpush1.msra.mxu1 %v1036_v7 }
 0x2f8   :  { %1089 = vmatprep.subr.mxu1 %v1370_v3 }
 0x2f9   :  { %1090 = vmatpush1.msra.mxu1 %v1035_v62 }
 0x2fa   :  { %1091 = vmatprep.subr.mxu1 %v1370_v3 }
 0x2fb   :  { %1092 = vmatpush1.msra.mxu1 %v1034_v63 }
 0x2fc   :  { %1093 = vmatprep.subr.mxu1 %v1370_v3 }
 0x2fd   :  { %1094 = vmatpush1.msra.mxu1 %v1033_v28 }
 0x2fe   :  { %1119 = vmatprep.subr.mxu1 %v1370_v3 }
 0x2ff   :  { %1120 = vmatpush2.msra.mxu1 %v1052_v30 }
 0x300   :  { %1121 = vmatprep.subr.mxu1 %v1370_v3 }
 0x301   :  { %1122 = vmatpush2.msra.mxu1 %v1051_v41 }
 0x302   :  { %1123 = vmatprep.subr.mxu1 %v1370_v3 }
 0x303   :  { %1124 = vmatpush2.msra.mxu1 %v1050_v17 }
 0x304   :  { %1125 = vmatprep.subr.mxu1 %v1370_v3 }
 0x305   :  { %1126 = vmatpush2.msra.mxu1 %v1049_v21 }
 0x319   :  { %v884_v42 = vpop.f32.mrf.mxu0 }
 0x31a   :  { %v885_v32 = vadd.f32 %v884_v42, %v811_v16 }
 0x31b   :  { %v886_v25 = vpop.f32.mrf.mxu0 }
 0x31c   :  { %v887_v31 = vadd.f32 %v886_v25, %v815_v11 }
 0x39e   :  { %v955_v4 = vpop.f32.mrf.mxu1 }
 0x39f   :  { %v956_v24 = vadd.f32 %v955_v4, %v885_v32  ;;  %v1026_v22 = vpop.f32.mrf.mxu0 }
 0x3a0   :  { %v957_v14 = vpop.f32.mrf.mxu1 }
 0x3a1   :  { %v958_v3 = vadd.f32 %v957_v14, %v887_v31  ;;  %v1028_v8 = vpop.f32.mrf.mxu0  ;;  %v1027_v13 = vadd.f32 %v1026_v22, %v956_v24 }
 0x3a3   :  { %v1029_v45 = vadd.f32 %v1028_v8, %v958_v3  ;;  %v1031_v5 = vmax.f32 %v1027_v13, 0.0 }
 0x3a5   :  { %v1032_v39 = vmax.f32 %v1029_v45, 0.0 }
 0x3a7   :  { %1174 = vmatprep.mubr.msk.f32.mxu1 %vm548_vm6, %v1032_v39 }
 0x3a8   :  { %1128 = vmatmul.mubr.f32.vlgmr.msra.gmra.mxu1 %v1031_v5 }
 0x468   :  { %v1129_v61 = vpop.f32.mrf.mxu1 }
 0x469   :  { %v1130_v1 = vadd.f32 %v1173_v57, %v1129_v61 }
 0x46a   :  { %v1131_v40 = vpop.f32.mrf.mxu1 }
 0x46b   :  { %v1136_v34 = vsel %vm1135_vm9, %v1130_v1, -inf }
 0x46c   :  { %1137 = vmax.xlane.f32.xlu0 %v1136_v34 }
 0x4f5   :  { %v1138_v51 = vpop.xlane.xlu0 %1137 }
 0x4f6   :  { %v1139_v9 = vsub.f32 %v1136_v34, %v1138_v51 }
 0x4f8   :  { %v1140_v33 = vmul.f32 1.442695, %v1139_v9 }
 0x4fa   :  { %1366 = vpow2.f32 %v1140_v33 }
 0x507   :  { %v1367_v35 = vpop.eup %1366 }
 0x508   :  { %1142 = vadd.xlane.f32.xlu1 %v1367_v35 }
 0x591   :  { %v1143_v37 = vpop.xlane.xlu1 %1142 }
 0x592   :  { %1368 = vrcp.f32 %v1143_v37 }
 0x59f   :  { %v1369_v0 = vpop.eup %1368 }
 0x5a0   :  { %v1145_v56 = vmul.f32 %v1369_v0, %v1143_v37 }
 0x5a2   :  { %v1146_v44 = vsub.f32 2.0, %v1145_v56 }
 0x5a4   :  { %v1147_v46 = vmul.f32 %v1369_v0, %v1146_v44 }
 0x5a6   :  { %v1149_v18 = vmul.f32 %v1367_v35, %v1147_v46 }
 0x5a8   :  { %v1150_v47 = vsel %vm1148_vm10, %v1130_v1, %v1149_v18 }
 0x5a9   :  { %1151 = vst [vmem:[%s2626_s7] sm:$0xff] %v1150_v47 }

</bundles_post_ra>
